<compile_context>
chip_gen: v7x
topology: tpu7x:2x2x1
jax: 0.10.0
libtpu: 0.0.40
codegen_flags: <defaults>
</compile_context>

<pallas_src>
import functools
import math

import jax
import jax.numpy as jnp
from jax.experimental import pallas as pl
from jax.experimental.pallas import tpu as pltpu


def _resident_spec(shape):
    """BlockSpec for a grid-constant block: fetched once, single-buffered."""
    index_map = lambda *_: (0,) * len(shape)
    try:
        return pl.BlockSpec(shape, index_map, pipeline_mode=pl.Buffered(1))
    except TypeError:  # older jax without pipeline_mode -> default buffering
        return pl.BlockSpec(shape, index_map)


def _vmem_limit_bytes():
    """~3/4 of physical VMEM: ~96 MiB on v5e/v6e (128 MiB), ~48 MiB on v7x (64 MiB)."""
    try:
        cap = pltpu.get_tpu_info().vmem_capacity_bytes
    except Exception:
        cap = 128 * 1024 * 1024
    return int(min(cap * 3 // 4, 100 * 1024 * 1024))


# --------------------------- kernel 1: KV build ------------------------------
def _kv_build_kernel(k_ref, v_ref, wk_ref, wv_ref, bk_ref, bv_ref, mask_ref,
                     kv_ref, *, cdt, scale):
    ci = pl.program_id(1)

    @pl.when(ci == 0)
    def _init():
        kv_ref[...] = jnp.zeros_like(kv_ref)

    kc = k_ref[0]                                      # (tk, D) compute dtype
    vc = v_ref[0]
    K = (jnp.dot(kc, wk_ref[...], preferred_element_type=jnp.float32)
         + bk_ref[...]).astype(cdt)
    V = (jnp.dot(vc, wv_ref[...], preferred_element_type=jnp.float32)
         + bv_ref[...]).astype(cdt)
    # K_c^T @ V_c -> (D, D); f32 accumulation directly into the resident output.
    kv_ref[0] += jax.lax.dot_general(
        K, V, (((0,), (0,)), ((), ())), preferred_element_type=jnp.float32)

    @pl.when(ci == pl.num_programs(1) - 1)
    def _finalize():
        # Keep only the per-head diagonal blocks and fold in 1/sqrt(d_k),
        # once per batch element (mask is a precomputed 0/1 input).
        kv_ref[0] = kv_ref[0] * mask_ref[...] * scale


# ----------------- kernel 2: Q projection, Q @ KV, output --------------------
def _attn_proj_kernel(q_ref, kv_ref, wq_ref, wo_ref, bq_ref, bo_ref, o_ref, *, cdt):
    q = q_ref[0]                                       # (tq, D)
    Q = (jnp.dot(q, wq_ref[...], preferred_element_type=jnp.float32)
         + bq_ref[...]).astype(cdt)
    ctx = jnp.dot(Q, kv_ref[0].astype(cdt),
                  preferred_element_type=jnp.float32).astype(cdt)
    out = jnp.dot(ctx, wo_ref[...], preferred_element_type=jnp.float32) + bo_ref[...]
    o_ref[0] = out.astype(o_ref.dtype)


# ------------------------------- wrapper -------------------------------------
def multi_head_attention(q, k, v, params, *, h, mask=None, tq=None, tk=None,
                         compute_dtype=jnp.bfloat16):
    assert mask is None, "attention mask not supported by the KV-cache rewrite"
    B, S, D = q.shape
    assert D % h == 0, "d_model must be divisible by h"
    assert D % 128 == 0, "d_model must be a multiple of 128 (lane-dense tiles)"
    d_k = D // h
    scale = 1.0 / math.sqrt(d_k)
    out_dtype = q.dtype
    cdt = jnp.dtype(compute_dtype)

    if tq is None:
        tq = min(S, 512)
    if tk is None:
        tk = min(S, 512)
    assert S % tq == 0 and S % tk == 0, "seq_len must be divisible by the tiles"
    assert tq % 8 == 0 and tk % 8 == 0
    nq, nk = S // tq, S // tk

    # bf16 operands halve HBM/VMEM traffic and run the MXU at native rate;
    # all accumulation stays f32.
    q, k, v = (x.astype(cdt) for x in (q, k, v))
    wq, wk, wv, wo = (params[n].astype(cdt) for n in ("wq", "wk", "wv", "wo"))
    bq, bk, bv, bo = (params[n].astype(cdt) for n in ("bq", "bk", "bv", "bo"))

    # Precomputed 0/1 per-head block-diagonal mask (heads never mix).
    head_id = jnp.arange(D, dtype=jnp.int32) // d_k
    head_mask = (head_id[:, None] == head_id[None, :]).astype(cdt)     # (D, D)

    w_spec = _resident_spec((D, D))
    b_spec = _resident_spec((1, D))
    vmem = _vmem_limit_bytes()

    # ---- kernel 1: block-diagonal (K^T V) / sqrt(d_k) per batch element -----
    kv = pl.pallas_call(
        functools.partial(_kv_build_kernel, cdt=cdt, scale=scale),
        out_shape=jax.ShapeDtypeStruct((B, D, D), jnp.float32),
        grid=(B, nk),
        in_specs=[pl.BlockSpec((1, tk, D), lambda b, c: (b, c, 0)),
                  pl.BlockSpec((1, tk, D), lambda b, c: (b, c, 0)),
                  w_spec, w_spec, b_spec, b_spec, w_spec],
        out_specs=pl.BlockSpec((1, D, D), lambda b, c: (b, 0, 0)),
        compiler_params=pltpu.CompilerParams(
            dimension_semantics=("parallel", "arbitrary"),
            vmem_limit_bytes=vmem),
    )(k, v, wk, wv, bk, bv, head_mask)

    # ---- kernel 2: per query tile: Q proj, Q @ KV, output proj --------------
    out = pl.pallas_call(
        functools.partial(_attn_proj_kernel, cdt=cdt),
        out_shape=jax.ShapeDtypeStruct((B, S, D), out_dtype),
        grid=(B, nq),
        in_specs=[pl.BlockSpec((1, tq, D), lambda b, i: (b, i, 0)),
                  pl.BlockSpec((1, D, D), lambda b, i: (b, 0, 0)),
                  w_spec, w_spec, b_spec, b_spec],
        out_specs=pl.BlockSpec((1, tq, D), lambda b, i: (b, i, 0)),
        compiler_params=pltpu.CompilerParams(
            dimension_semantics=("parallel", "parallel"),
            vmem_limit_bytes=vmem),
    )(q, kv, wq, wo, bq, bo)
    return out


def reference_forward(q, k, v, params, *, h):
    """Pure-JAX replica of the PyTorch forward (no softmax, eval-mode dropout)."""
    B, S, D = q.shape
    d_k = D // h
    Q = q @ params["wq"] + params["bq"]
    K = k @ params["wk"] + params["bk"]
    V = v @ params["wv"] + params["bv"]
    Qh = Q.reshape(B, S, h, d_k).transpose(0, 2, 1, 3)
    Kh = K.reshape(B, S, h, d_k).transpose(0, 2, 1, 3)
    Vh = V.reshape(B, S, h, d_k).transpose(0, 2, 1, 3)
    scores = jnp.einsum("bhqd,bhkd->bhqk", Qh, Kh) / math.sqrt(d_k)
    x = jnp.einsum("bhqk,bhkd->bhqd", scores, Vh)
    x = x.transpose(0, 2, 1, 3).reshape(B, S, D)
    return x @ params["wo"] + params["bo"]


if __name__ == "__main__":
    # Small but lane-dense shapes: d_model multiple of 128, seq multiple of 8.
    B, S, D, H = 2, 256, 256, 4          # d_k = 64

    key = jax.random.PRNGKey(0)
    keys = jax.random.split(key, 11)
    std = 1.0 / math.sqrt(D)

    params = {
        "wq": jax.random.normal(keys[0], (D, D), jnp.float32) * std,
        "wk": jax.random.normal(keys[1], (D, D), jnp.float32) * std,
        "wv": jax.random.normal(keys[2], (D, D), jnp.float32) * std,
        "wo": jax.random.normal(keys[3], (D, D), jnp.float32) * std,
        "bq": jax.random.normal(keys[4], (1, D), jnp.float32) * std,
        "bk": jax.random.normal(keys[5], (1, D), jnp.float32) * std,
        "bv": jax.random.normal(keys[6], (1, D), jnp.float32) * std,
        "bo": jax.random.normal(keys[7], (1, D), jnp.float32) * std,
    }
    q = jax.random.normal(keys[8], (B, S, D), jnp.float32)
    k = jax.random.normal(keys[9], (B, S, D), jnp.float32)
    v = jax.random.normal(keys[10], (B, S, D), jnp.float32)

    with jax.default_matmul_precision("highest"):
        ref = reference_forward(q, k, v, params, h=H)
    ref_scale = float(jnp.max(jnp.abs(ref))) + 1e-12

    # f32 compute path: must track the high-precision reference closely.
    out_f32 = multi_head_attention(q, k, v, params, h=H,
                                   compute_dtype=jnp.float32)
    out_f32 = jax.block_until_ready(out_f32)
    assert out_f32.shape == (B, S, D)
    err_f32 = float(jnp.max(jnp.abs(out_f32 - ref))) / ref_scale
    assert err_f32 < 5e-3, f"f32 mismatch vs reference: rel_err={err_f32}"

    # Default bf16 compute path (f32 accumulation); looser tolerance.
    out_bf16 = multi_head_attention(q, k, v, params, h=H)
    out_bf16 = jax.block_until_ready(out_bf16)
    assert out_bf16.shape == (B, S, D)
    err_bf16 = float(jnp.max(jnp.abs(out_bf16.astype(jnp.float32) - ref))) / ref_scale
    assert err_bf16 < 5e-2, f"bf16 mismatch vs reference: rel_err={err_bf16}"

    print("KERNEL_OK")
</pallas_src>

<mosaic_0001>
module attributes {stable_mosaic.version = 11 : i64} {
  func.func @_kv_build_kernel(%arg0: i32, %arg1: i32, %arg2: memref<1x256x256xf32, #tpu.memory_space<vmem>>, %arg3: memref<1x256x256xf32, #tpu.memory_space<vmem>>, %arg4: memref<256x256xf32, #tpu.memory_space<vmem>>, %arg5: memref<256x256xf32, #tpu.memory_space<vmem>>, %arg6: memref<1x256xf32, #tpu.memory_space<vmem>>, %arg7: memref<1x256xf32, #tpu.memory_space<vmem>>, %arg8: memref<256x256xf32, #tpu.memory_space<vmem>>, %arg9: memref<1x256x256xf32, #tpu.memory_space<vmem>>) attributes {dimension_semantics = [#tpu.dimension_semantics<parallel>, #tpu.dimension_semantics<arbitrary>], iteration_bounds = array<i64: 2, 1>, scalar_prefetch = 0 : i64, scratch_operands = 0 : i64, tpu.core_type = #tpu.core_type<tc>, window_params = [{transform_indices = @transform_0, window_bounds = array<i64: 1, 256, 256>}, {transform_indices = @transform_1, window_bounds = array<i64: 1, 256, 256>}, {pipeline_mode = #tpu.pipeline_mode<synchronous>, transform_indices = @transform_2, window_bounds = array<i64: 256, 256>}, {pipeline_mode = #tpu.pipeline_mode<synchronous>, transform_indices = @transform_3, window_bounds = array<i64: 256, 256>}, {pipeline_mode = #tpu.pipeline_mode<synchronous>, transform_indices = @transform_4, window_bounds = array<i64: 1, 256>}, {pipeline_mode = #tpu.pipeline_mode<synchronous>, transform_indices = @transform_5, window_bounds = array<i64: 1, 256>}, {pipeline_mode = #tpu.pipeline_mode<synchronous>, transform_indices = @transform_6, window_bounds = array<i64: 256, 256>}, {transform_indices = @transform_7, window_bounds = array<i64: 1, 256, 256>}]} {
    %c0_i32 = arith.constant 0 : i32
    %0 = arith.cmpi eq, %arg1, %c0_i32 : i32
    %1 = arith.extui %0 : i1 to i32
    %c0_i32_0 = arith.constant 0 : i32
    %2 = arith.cmpi ne, %1, %c0_i32_0 : i32
    scf.if %2 {
      %cst_24 = arith.constant 0.000000e+00 : f32
      %27 = vector.broadcast %cst_24 : f32 to vector<1x256x256xf32>
      %c0_25 = arith.constant 0 : index
      %c0_26 = arith.constant 0 : index
      %c0_27 = arith.constant 0 : index
      %28 = vector.load %arg9[%c0_25, %c0_26, %c0_27] : memref<1x256x256xf32, #tpu.memory_space<vmem>>, vector<1x256x256xf32>
      tpu.vector_store %arg9[%c0_25, %c0_26, %c0_27], %27 {strides = array<i32>} : memref<1x256x256xf32, #tpu.memory_space<vmem>>, vector<1x256x256xf32>,
    } else {
    }
    %c0 = arith.constant 0 : index
    %c0_1 = arith.constant 0 : index
    %c0_2 = arith.constant 0 : index
    %3 = vector.load %arg2[%c0, %c0_1, %c0_2] : memref<1x256x256xf32, #tpu.memory_space<vmem>>, vector<1x256x256xf32>
    %4 = vector.shape_cast %3 : vector<1x256x256xf32> to vector<256x256xf32>
    %c0_3 = arith.constant 0 : index
    %c0_4 = arith.constant 0 : index
    %c0_5 = arith.constant 0 : index
    %5 = vector.load %arg3[%c0_3, %c0_4, %c0_5] : memref<1x256x256xf32, #tpu.memory_space<vmem>>, vector<1x256x256xf32>
    %6 = vector.shape_cast %5 : vector<1x256x256xf32> to vector<256x256xf32>
    %c0_6 = arith.constant 0 : index
    %c0_7 = arith.constant 0 : index
    %7 = vector.load %arg4[%c0_6, %c0_7] : memref<256x256xf32, #tpu.memory_space<vmem>>, vector<256x256xf32>
    %cst = arith.constant dense<0.000000e+00> : vector<256x256xf32>
    %8 = tpu.matmul %4, %7, %cst {dimension_numbers = #tpu.dot_dimension_numbers<[1], [0], [0], [1], [0, 0, 1, 1], [], []>} : vector<256x256xf32>, vector<256x256xf32>, vector<256x256xf32> -> vector<256x256xf32>
    %c0_8 = arith.constant 0 : index
    %c0_9 = arith.constant 0 : index
    %9 = vector.load %arg6[%c0_8, %c0_9] : memref<1x256xf32, #tpu.memory_space<vmem>>, vector<1x256xf32>
    %10 = vector.broadcast %9 : vector<1x256xf32> to vector<256x256xf32>
    %11 = arith.addf %8, %10 : vector<256x256xf32>
    %c0_10 = arith.constant 0 : index
    %c0_11 = arith.constant 0 : index
    %12 = vector.load %arg5[%c0_10, %c0_11] : memref<256x256xf32, #tpu.memory_space<vmem>>, vector<256x256xf32>
    %cst_12 = arith.constant dense<0.000000e+00> : vector<256x256xf32>
    %13 = tpu.matmul %6, %12, %cst_12 {dimension_numbers = #tpu.dot_dimension_numbers<[1], [0], [0], [1], [0, 0, 1, 1], [], []>} : vector<256x256xf32>, vector<256x256xf32>, vector<256x256xf32> -> vector<256x256xf32>
    %c0_13 = arith.constant 0 : index
    %c0_14 = arith.constant 0 : index
    %14 = vector.load %arg7[%c0_13, %c0_14] : memref<1x256xf32, #tpu.memory_space<vmem>>, vector<1x256xf32>
    %15 = vector.broadcast %14 : vector<1x256xf32> to vector<256x256xf32>
    %16 = arith.addf %13, %15 : vector<256x256xf32>
    %c0_15 = arith.constant 0 : index
    %c0_16 = arith.constant 0 : index
    %c0_17 = arith.constant 0 : index
    %17 = vector.load %arg9[%c0_15, %c0_16, %c0_17] : memref<1x256x256xf32, #tpu.memory_space<vmem>>, vector<1x256x256xf32>
    %18 = vector.shape_cast %17 : vector<1x256x256xf32> to vector<256x256xf32>
    %cst_18 = arith.constant dense<0.000000e+00> : vector<256x256xf32>
    %19 = tpu.matmul %11, %16, %cst_18 {dimension_numbers = #tpu.dot_dimension_numbers<[0], [0], [1], [1], [0, 1, 1, 1], [], []>} : vector<256x256xf32>, vector<256x256xf32>, vector<256x256xf32> -> vector<256x256xf32>
    %20 = arith.addf %18, %19 : vector<256x256xf32>
    %c0_19 = arith.constant 0 : index
    %c0_20 = arith.constant 0 : index
    %c0_21 = arith.constant 0 : index
    %21 = vector.load %arg9[%c0_19, %c0_20, %c0_21] : memref<1x256x256xf32, #tpu.memory_space<vmem>>, vector<1x256x256xf32>
    %22 = vector.shape_cast %21 : vector<1x256x256xf32> to vector<256x256xf32>
    %23 = vector.shape_cast %20 : vector<256x256xf32> to vector<1x256x256xf32>
    tpu.vector_store %arg9[%c0_19, %c0_20, %c0_21], %23 {strides = array<i32>} : memref<1x256x256xf32, #tpu.memory_space<vmem>>, vector<1x256x256xf32>,
    %c0_i32_22 = arith.constant 0 : i32
    %24 = arith.cmpi eq, %arg1, %c0_i32_22 : i32
    %25 = arith.extui %24 : i1 to i32
    %c0_i32_23 = arith.constant 0 : i32
    %26 = arith.cmpi ne, %25, %c0_i32_23 : i32
    scf.if %26 {
      %c0_24 = arith.constant 0 : index
      %c0_25 = arith.constant 0 : index
      %c0_26 = arith.constant 0 : index
      %27 = vector.load %arg9[%c0_24, %c0_25, %c0_26] : memref<1x256x256xf32, #tpu.memory_space<vmem>>, vector<1x256x256xf32>
      %28 = vector.shape_cast %27 : vector<1x256x256xf32> to vector<256x256xf32>
      %c0_27 = arith.constant 0 : index
      %c0_28 = arith.constant 0 : index
      %29 = vector.load %arg8[%c0_27, %c0_28] : memref<256x256xf32, #tpu.memory_space<vmem>>, vector<256x256xf32>
      %30 = arith.mulf %28, %29 : vector<256x256xf32>
      %cst_29 = arith.constant 1.250000e-01 : f32
      %31 = vector.broadcast %cst_29 : f32 to vector<256x256xf32>
      %32 = arith.mulf %30, %31 : vector<256x256xf32>
      %c0_30 = arith.constant 0 : index
      %c0_31 = arith.constant 0 : index
      %c0_32 = arith.constant 0 : index
      %33 = vector.load %arg9[%c0_30, %c0_31, %c0_32] : memref<1x256x256xf32, #tpu.memory_space<vmem>>, vector<1x256x256xf32>
      %34 = vector.shape_cast %33 : vector<1x256x256xf32> to vector<256x256xf32>
      %35 = vector.shape_cast %32 : vector<256x256xf32> to vector<1x256x256xf32>
      tpu.vector_store %arg9[%c0_30, %c0_31, %c0_32], %35 {strides = array<i32>} : memref<1x256x256xf32, #tpu.memory_space<vmem>>, vector<1x256x256xf32>,
    } else {
    }
    return
  }
  func.func @transform_0(%arg0: i32, %arg1: i32) -> (i32, i32, i32) {
    %c0_i32 = arith.constant 0 : i32
    %c0_i32_0 = arith.constant 0 : i32
    return %arg0, %arg1, %c0_i32 : i32, i32, i32
  }
  func.func @transform_1(%arg0: i32, %arg1: i32) -> (i32, i32, i32) {
    %c0_i32 = arith.constant 0 : i32
    %c0_i32_0 = arith.constant 0 : i32
    return %arg0, %arg1, %c0_i32 : i32, i32, i32
  }
  func.func @transform_2(%arg0: i32, %arg1: i32) -> (i32, i32) {
    %c0_i32 = arith.constant 0 : i32
    %c0_i32_0 = arith.constant 0 : i32
    %c0_i32_1 = arith.constant 0 : i32
    return %c0_i32, %c0_i32_0 : i32, i32
  }
  func.func @transform_3(%arg0: i32, %arg1: i32) -> (i32, i32) {
    %c0_i32 = arith.constant 0 : i32
    %c0_i32_0 = arith.constant 0 : i32
    %c0_i32_1 = arith.constant 0 : i32
    return %c0_i32, %c0_i32_0 : i32, i32
  }
  func.func @transform_4(%arg0: i32, %arg1: i32) -> (i32, i32) {
    %c0_i32 = arith.constant 0 : i32
    %c0_i32_0 = arith.constant 0 : i32
    %c0_i32_1 = arith.constant 0 : i32
    return %c0_i32, %c0_i32_0 : i32, i32
  }
  func.func @transform_5(%arg0: i32, %arg1: i32) -> (i32, i32) {
    %c0_i32 = arith.constant 0 : i32
    %c0_i32_0 = arith.constant 0 : i32
    %c0_i32_1 = arith.constant 0 : i32
    return %c0_i32, %c0_i32_0 : i32, i32
  }
  func.func @transform_6(%arg0: i32, %arg1: i32) -> (i32, i32) {
    %c0_i32 = arith.constant 0 : i32
    %c0_i32_0 = arith.constant 0 : i32
    %c0_i32_1 = arith.constant 0 : i32
    return %c0_i32, %c0_i32_0 : i32, i32
  }
  func.func @transform_7(%arg0: i32, %arg1: i32) -> (i32, i32, i32) {
    %c0_i32 = arith.constant 0 : i32
    %c0_i32_0 = arith.constant 0 : i32
    %c0_i32_1 = arith.constant 0 : i32
    return %arg0, %c0_i32, %c0_i32_0 : i32, i32, i32
  }
}

</mosaic_0001>

<bundles_post_ra>
// kernel: tpu_custom_call.1
= control target key start
LH: loop header
LB: loop body
LE: loop exit
PB: predicated region body
PF: predicated region fallthrough
CT: control target
= control target key end

     0   :  { %s4172_s0 = inlined_call_operand.hbm [shape: f32[2,256,256], index: 0, kind: input, shape index: {}]   ;;  %s4173_s1 = inlined_call_operand.hbm [shape: f32[2,256,256], index: 1, kind: input, shape index: {}]   ;;  %s4174_s2 = inlined_call_operand.hbm [shape: f32[256,256], index: 2, kind: input, shape index: {}]   ;;  %s4175_s3 = inlined_call_operand.hbm [shape: f32[256,256], index: 3, kind: input, shape index: {}]   ;;  %s4176_s4 = inlined_call_operand.hbm [shape: f32[1,256], index: 4, kind: input, shape index: {}]   ;;  %s4177_s5 = inlined_call_operand.hbm [shape: f32[1,256], index: 5, kind: input, shape index: {}]   ;;  %s4178_s6 = inlined_call_operand.hbm [shape: f32[256,256], index: 6, kind: input, shape index: {}]   ;;  %s4179_s7 = inlined_call_operand.hbm [shape: f32[2,256,256], index: 7, kind: output, shape index: {}]  }
   0x1   :  { %4188 = sst [smem:[#allocation21_spill]] %s4174_s2 }
   0x2   :  { %4189 = sst [smem:[#allocation22_spill]] %s4175_s3 }
   0x3   :  { %4190 = sst [smem:[#allocation23_spill]] %s4176_s4 }
   0x4   :  { %4191 = sst [smem:[#allocation24_spill]] %s4177_s5 }
   0x5   :  { %4192 = sst [smem:[#allocation25_spill]] %s4178_s6 }
   0x6   :  { %4193 = sst [smem:[#allocation26_spill]] %s4179_s7 }
   0x7   :  { %12 = vsyncpa [#allocation3], 0 }
   0x8   :  { %14 = vsyncpa [#allocation3 + $0x1], 0 }
   0x9   :  { %15 = vsyncpa [#allocation6], 0 }
   0xa   :  { %17 = vsyncpa [#allocation6 + $0x1], 0 }
   0xb   :  { %18 = vsyncpa [#allocation9], 0 }
   0xc   :  { %19 = vsyncpa [#allocation12], 0 }
   0xd   :  { %20 = vsyncpa [#allocation4], 0 }
   0xe   :  { %22 = vsyncpa [#allocation4 + $0x1], 0  ;;  %s3317_s24 = smov 0   ;;  %s3319_s25 = smov 0  }
   0xf   :  { %s3321_s26 = smov 0   ;;  %s3323_s27 = smov 0  }
  0x10   :  { %s3325_s28 = smov 0   ;;  %s3327_s29 = smov 0  }
  0x11 LB: > { %s3348_s30 = sadd.s32 4294967295, %s3263_s29   ;;  %p2364_p0 = scmp.ge.s32.totalorder %s3263_s29, 1  ;;  %s3263_s29 = sphi %s3327_s29, %s28_s29   ;;  %s3259_s28 = sphi %s3325_s28, %s4225_s28   ;;  %s3255_s27 = sphi %s3323_s27, %s4224_s27   ;;  %s3251_s26 = sphi %s3321_s26, %s4223_s26   ;;  %s3247_s25 = sphi %s3319_s25, %s4222_s25   ;;  %s3243_s24 = sphi %s3317_s24, %s4221_s24  }
  0x12   : > { %p4181_p1 = scmp.eq.s32.totalorder %s3348_s30, 0  ;;  %p232_p2 = scmp.lt.s32.totalorder %s3263_s29, 3 }
  0x13   : > { %s3265_s9 = smov [#allocation7]   ;;  %s3266_s12 = smov [#allocation8]  }
  0x14   : > { %p3353_p3 = pnand %p2364_p0, %p232_p2  ;;  %s244_s10 = sshll.u32 %s3265_s9, 4  ;;  %s3357_s10 = int_to_ptr.vmem [resolvable:$true] %s244_s10 }
  0x15   : > { %s257_s13 = sshll.u32 %s3266_s12, 4  ;;  %s3267_s14 = smov [#allocation11]   ;;  %s3368_s13 = int_to_ptr.vmem [resolvable:$true] %s257_s13 }
  0x16   : > { %s4194_s8 = scalar_select %p3353_p3, 1, 0 }
  0x17   : > { %p2644_p4 = pneg %p3353_p3  ;;  %s3370_s15 = sshll.u32 %s3267_s14, 4  ;;  %s283_s15 = int_to_ptr.vmem [resolvable:$true] %s3370_s15 }
  0x18   : > { %s4196_s2 = sld [smem:[#allocation21_spill]] }
  0x19   : > { %p3364_p6 = pnand %p2644_p4, %p4181_p1 }
  0x1b   : > { %p3380_p8 = pneg %p3364_p6 }
  0x1e   : > { %s2965_s18 = scalar_lea.hbm %s4196_s2, 8192 }
  0x1f   : > { %p2966_p7 = scmp.ne.s32.totalorder %s4196_s2, %s2965_s18  ;;  %p2972_p11 = scmp.lt.u32.totalorder %s2965_s18, %s4196_s2 }
  0x21   : > { %p2968_p9 = pnand %p3380_p8, %p2966_p7 }
  0x23   : > { %p2969_p10 = pneg %p2968_p9 }
  0x25   : > { %p2974_p12 = pnand %p2972_p11, %p2969_p10 }
  0x27   : > { %2977 = shalt.err (!%p2974_p12)
}
  0x28   : > { %s2978_s9 = scalar_lea.vmem %s3357_s10, 8192  ;;  %p2986_p4 = scmp.lt.s32.totalorder %s3357_s10, %s3357_s10 }
  0x29   : > { %p2979_p13 = scmp.ne.s32.totalorder %s3357_s10, %s2978_s9  ;;  %p2987_p5 = scmp.lt.s32.totalorder %s2978_s9, %s2978_s9 }
  0x2b   : > { %p2981_p0 = pnand %p2979_p13, %p3380_p8  ;;  %p2988_p7 = por %p2987_p5, %p2986_p4 }
  0x2d   : > { %p2982_p2 = pneg %p2981_p0 }
  0x2f   : > { %p2989_p9 = pnand %p2988_p7, %p2982_p2 }
  0x31   : > { %2992 = shalt.err (!%p2989_p9)
}
  0x32   : > { %s4183_s12 = smov 256   ;;  %s4185_s14 = smov 16  }
  0x33   : > { %2647 = dma.hbm_to_vmem [thread:$0]  (!%p3364_p6), %s4196_s2, 8192, %s3357_s10, [#allocation6], %s4183_s12, %s4183_s12, %s4185_s14  }
  0x34   : > { %s4198_s3 = sld [smem:[#allocation22_spill]] }
  0x3a   : > { %s2993_s20 = scalar_lea.hbm %s4198_s3, 8192 }
  0x3b   : > { %p2994_p5 = scmp.ne.s32.totalorder %s4198_s3, %s2993_s20  ;;  %p3000_p12 = scmp.lt.u32.totalorder %s2993_s20, %s4198_s3 }
  0x3d   : > { %p2996_p10 = pnand %p2994_p5, %p3380_p8 }
  0x3f   : > { %p2997_p11 = pneg %p2996_p10 }
  0x41   : > { %p3002_p13 = pnand %p3000_p12, %p2997_p11 }
  0x43   : > { %3005 = shalt.err (!%p3002_p13)
}
  0x44   : > { %s3006_s10 = scalar_lea.vmem %s3368_s13, 8192  ;;  %p3014_p7 = scmp.lt.s32.totalorder %s3368_s13, %s3368_s13 }
  0x45   : > { %p3007_p0 = scmp.ne.s32.totalorder %s3368_s13, %s3006_s10  ;;  %p3015_p9 = scmp.lt.s32.totalorder %s3006_s10, %s3006_s10 }
  0x47   : > { %p3009_p2 = pnand %p3007_p0, %p3380_p8  ;;  %p3016_p5 = por %p3015_p9, %p3014_p7 }
  0x49   : > { %p3010_p4 = pneg %p3009_p2 }
  0x4b   : > { %p3017_p10 = pnand %p3016_p5, %p3010_p4 }
  0x4d   : > { %3020 = shalt.err (!%p3017_p10)
}
  0x4e   : > { %2650 = dma.hbm_to_vmem [thread:$0]  (!%p3364_p6), %s4198_s3, 8192, %s3368_s13, [#allocation9], %s4183_s12, %s4183_s12, %s4185_s14  }
  0x4f   : > { %s4199_s5 = sld [smem:[#allocation24_spill]] }
  0x55   : > { %s3021_s19 = scalar_lea.hbm %s4199_s5, 32 }
  0x56   : > { %p3022_p11 = scmp.ne.s32.totalorder %s4199_s5, %s3021_s19  ;;  %p3028_p0 = scmp.lt.u32.totalorder %s3021_s19, %s4199_s5 }
  0x58   : > { %p3024_p12 = pnand %p3022_p11, %p3380_p8 }
  0x5a   : > { %p3025_p13 = pneg %p3024_p12 }
  0x5c   : > { %p3030_p2 = pnand %p3028_p0, %p3025_p13 }
  0x5e   : > { %3033 = shalt.err (!%p3030_p2)
}
  0x5f   : > { %s3034_s10 = scalar_lea.vmem %s283_s15, 32  ;;  %p3042_p5 = scmp.lt.s32.totalorder %s283_s15, %s283_s15 }
  0x60   : > { %p3035_p4 = scmp.ne.s32.totalorder %s283_s15, %s3034_s10  ;;  %p3043_p10 = scmp.lt.s32.totalorder %s3034_s10, %s3034_s10 }
  0x62   : > { %p3037_p7 = pnand %p3035_p4, %p3380_p8  ;;  %p3044_p1 = por %p3043_p10, %p3042_p5 }
  0x64   : > { %p3038_p9 = pneg %p3037_p7 }
  0x66   : > { %p3045_p3 = pnand %p3044_p1, %p3038_p9 }
  0x68   : > { %3048 = shalt.err (!%p3045_p3)
}
  0x69   : > { %2656 = dma.hbm_to_vmem [thread:$0]  (!%p3364_p6), %s4199_s5, 32, %s283_s15, [#allocation12]  }
  0x6a   : > { %s3270_s16 = smov [#allocation10]   ;;  %s3271_s18 = smov [#allocation13]  }
  0x6b   : > { %s271_s17 = sshll.u32 %s3270_s16, 4  ;;  %s292_s19 = sshll.u32 %s3271_s18, 4  ;;  %s272_s17 = int_to_ptr.vmem [resolvable:$true] %s271_s17  ;;  %s293_s19 = int_to_ptr.vmem [resolvable:$true] %s292_s19 }
  0x6c   : > { %s4200_s4 = sld [smem:[#allocation23_spill]] }
  0x72   : > { %s3049_s23 = scalar_lea.hbm %s4200_s4, 32 }
  0x73   : > { %p3050_p1 = scmp.ne.s32.totalorder %s4200_s4, %s3049_s23  ;;  %p3056_p12 = scmp.lt.u32.totalorder %s3049_s23, %s4200_s4 }
  0x75   : > { %p3052_p3 = pnand %p3050_p1, %p3380_p8 }
  0x77   : > { %p3053_p11 = pneg %p3052_p3 }
  0x79   : > { %p3058_p13 = pnand %p3056_p12, %p3053_p11 }
  0x7b   : > { %3061 = shalt.err (!%p3058_p13)
}
  0x7c   : > { %s3062_s15 = scalar_lea.vmem %s272_s17, 32  ;;  %p3070_p7 = scmp.lt.s32.totalorder %s272_s17, %s272_s17 }
  0x7d   : > { %p3063_p0 = scmp.ne.s32.totalorder %s272_s17, %s3062_s15  ;;  %p3071_p9 = scmp.lt.s32.totalorder %s3062_s15, %s3062_s15 }
  0x7f   : > { %p3065_p2 = pnand %p3063_p0, %p3380_p8  ;;  %p3072_p5 = por %p3071_p9, %p3070_p7 }
  0x81   : > { %p3066_p4 = pneg %p3065_p2 }
  0x83   : > { %p3073_p10 = pnand %p3072_p5, %p3066_p4 }
  0x85   : > { %3076 = shalt.err (!%p3073_p10)
}
  0x86   : > { %2653 = dma.hbm_to_vmem [thread:$0]  (!%p3364_p6), %s4200_s4, 32, %s272_s17, [#allocation9]  }
  0x87   : > { %s4201_s6 = sld [smem:[#allocation25_spill]] }
  0x8d   : > { %s3077_s20 = scalar_lea.hbm %s4201_s6, 8192 }
  0x8e   : > { %p3078_p1 = scmp.ne.s32.totalorder %s4201_s6, %s3077_s20  ;;  %p3084_p12 = scmp.lt.u32.totalorder %s3077_s20, %s4201_s6 }
  0x90   : > { %p3080_p3 = pnand %p3078_p1, %p3380_p8 }
  0x92   : > { %p3081_p11 = pneg %p3080_p3 }
  0x94   : > { %p3086_p13 = pnand %p3084_p12, %p3081_p11 }
  0x96   : > { %3089 = shalt.err (!%p3086_p13)
}
  0x97   : > { %s3090_s13 = scalar_lea.vmem %s293_s19, 8192  ;;  %p3098_p7 = scmp.lt.s32.totalorder %s293_s19, %s293_s19 }
  0x98   : > { %p3091_p0 = scmp.ne.s32.totalorder %s293_s19, %s3090_s13  ;;  %p3099_p9 = scmp.lt.s32.totalorder %s3090_s13, %s3090_s13 }
  0x9a   : > { %p3093_p2 = pnand %p3091_p0, %p3380_p8  ;;  %p3100_p5 = por %p3099_p9, %p3098_p7 }
  0x9c   : > { %p3094_p4 = pneg %p3093_p2 }
  0x9e   : > { %p3101_p10 = pnand %p3100_p5, %p3094_p4 }
  0xa0   : > { %3104 = shalt.err (!%p3101_p10)
}
  0xa1   : > { %s4202_s17 = smov 256   ;;  %s2363_s11 = sadd.s32 4294967294, %s3263_s29  }
  0xa2   : > { %2659 = dma.hbm_to_vmem [thread:$0]  (!%p3364_p6), %s4201_s6, 8192, %s293_s19, [#allocation12], %s4202_s17, %s4202_s17, %s4185_s14  }
  0xa3   : > { %s40_s21 = sadd.s32 1, %s3259_s28  ;;  %s49_s16 = sadd.s32 1, %s3251_s26 }
  0xa4   : > { %p42_p8 = scmp.ge.s32.totalorder %s40_s21, 2  ;;  %p56_p1 = scmp.ne.s32.totalorder %s3251_s26, %s3247_s25 }
  0xa5   : > { %p57_p3 = scmp.eq.s32.totalorder %s3263_s29, 0  ;;  %p62_p11 = scmp.ne.s32.totalorder %s3247_s25, %s3243_s24 }
  0xa6   : > { %s4227_s21 = smov (%p42_p8, %s40_s21), 0  ;;  %p4204_p13 = scmp.eq.s32.totalorder %s3348_s30, 0 }
  0xa7   : > { %p3498_p12 = por %p57_p3, %p56_p1  ;;  %s44_s18 = ssub.s32 %s3259_s28, %s4227_s21 }
  0xa8   : > { %p3504_p6 = por %p4204_p13, %p62_p11  ;;  %p219_p0 = scmp.eq.s32.totalorder %s3348_s30, 1 }
  0xa9   : > { %p47_p2 = scmp.eq.s32.totalorder %s44_s18, 0  ;;  %p225_p4 = scmp.eq.s32.totalorder %s2363_s11, 1 }
  0xaa   : > { %p3511_p7 = por %p219_p0, %p56_p1  ;;  %p2676_p9 = scmp.lt.s32.totalorder %s3263_s29, 2 }
  0xab   : > { %s3517_s22 = scalar_select %p47_p2, %s3251_s26, %s49_s16  }
  0xac   : > { %s4206_s20 = scalar_select %p3511_p7, 1, 0 }
  0xad   : > { %p3519_p5 = por %p225_p4, %p62_p11  ;;  %s306_s9 = sand.u32 1, %s3251_s26  }
  0xae   : > { %s2371_s10 = sshll.u32 %s306_s9, 9  ;;  %s2391_s13 = sshll.u32 %s3259_s28, 13 }
  0xaf   : > { %s4207_s23 = scalar_select %p3519_p5, 1, 0 }
  0xb0   : > { %s3528_s14 = scalar_lea.hbm %s4172_s0, %s2391_s13  ;;  %s310_s11 = scalar_lea.vmem [#allocation2], %s2371_s10 }
  0xb1   : > { %s320_s18 = sshll.u32 %s310_s11, 4  ;;  %p3534_p10 = pnand %p2676_p9, %p3498_p12  ;;  %s3530_s18 = int_to_ptr.vmem [resolvable:$true] %s320_s18 }
  0xb2   : > { %s3541_s15 = scalar_lea.hbm %s4173_s1, %s2391_s13  ;;  %s334_s7 = scalar_lea.vmem [#allocation5], %s2371_s10 }
  0xb3   : > { %s3543_s4 = sshll.u32 %s334_s7, 4  ;;  %s3545_s5 = scalar_lea.sflag [#allocation3], %s306_s9  ;;  %s3577_s4 = int_to_ptr.vmem [resolvable:$true] %s3543_s4 }
  0xb4   : > { %s3105_s11 = scalar_lea.hbm %s3528_s14, 8192  ;;  %p3107_p1 = pneg %p3534_p10 }
  0xb5   : > { %p3106_p8 = scmp.ne.s32.totalorder %s3528_s14, %s3105_s11  ;;  %s3110_s2 = scalar_lea.hbm %s4172_s0, 16384 }
  0xb6   : > { %p3111_p12 = scmp.lt.u32.totalorder %s3528_s14, %s4172_s0  ;;  %p3112_p13 = scmp.lt.u32.totalorder %s3110_s2, %s3105_s11 }
  0xb7   : > { %p3108_p3 = pnand %p3107_p1, %p3106_p8  ;;  %p3114_p2 = scmp.lt.u32.totalorder %s3105_s11, %s3528_s14 }
  0xb8   : > { %p3113_p0 = por %p3112_p13, %p3111_p12 }
  0xb9   : > { %p3109_p11 = pneg %p3108_p3 }
  0xba   : > { %p3115_p4 = por %p3114_p2, %p3113_p0 }
  0xbc   : > { %p3116_p9 = pnand %p3115_p4, %p3109_p11 }
  0xbe   : > { %3119 = shalt.err (!%p3116_p9)
}
  0xbf   : > { %s3120_s9 = scalar_lea.vmem %s3530_s18, 8192  ;;  %s3272_s6 = smov [#allocation2]  }
  0xc0   : > { %p3121_p8 = scmp.ne.s32.totalorder %s3530_s18, %s3120_s9  ;;  %s3125_s10 = sshll.u32 %s3272_s6, 4  ;;  %s3126_s10 = int_to_ptr.vmem [resolvable:$false] %s3125_s10 }
  0xc1   : > { %s3127_s7 = scalar_lea.vmem %s3126_s10, 16384  ;;  %p3128_p7 = scmp.lt.s32.totalorder %s3530_s18, %s3126_s10 }
  0xc2   : > { %p3123_p3 = pnand %p3121_p8, %p3107_p1  ;;  %p3129_p12 = scmp.lt.s32.totalorder %s3127_s7, %s3120_s9 }
  0xc4   : > { %p3124_p5 = pneg %p3123_p3  ;;  %p3130_p13 = por %p3129_p12, %p3128_p7 }
  0xc6   : > { %p3131_p0 = pnand %p3130_p13, %p3124_p5 }
  0xc8   : > { %3134 = shalt.err (!%p3131_p0)
}
  0xc9   : > { %s4209_s11 = smov 16   ;;  %s330_s12 = sand.u32 1, %s3263_s29  }
  0xca   : > { %2663 = dma.hbm_to_vmem [thread:$0]  (!%p3534_p10), %s3528_s14, 8192, %s3530_s18, %s3545_s5, %s4202_s17, %s4202_s17, %s4209_s11  }
  0xcb   : > { %s3580_s2 = scalar_lea.sflag [#allocation6], %s330_s12  ;;  %s3135_s3 = scalar_lea.hbm %s3541_s15, 8192 }
  0xcc   : > { %p3136_p7 = scmp.ne.s32.totalorder %s3541_s15, %s3135_s3  ;;  %s3140_s6 = scalar_lea.hbm %s4173_s1, 16384 }
  0xcd   : > { %p3141_p2 = scmp.lt.u32.totalorder %s3541_s15, %s4173_s1  ;;  %p3142_p4 = scmp.lt.u32.totalorder %s3140_s6, %s3135_s3 }
  0xce   : > { %p3138_p5 = pnand %p3136_p7, %p3107_p1  ;;  %p3144_p8 = scmp.lt.u32.totalorder %s3135_s3, %s3541_s15 }
  0xcf   : > { %p3143_p9 = por %p3142_p4, %p3141_p2 }
  0xd0   : > { %p3139_p11 = pneg %p3138_p5 }
  0xd1   : > { %p3145_p3 = por %p3144_p8, %p3143_p9 }
  0xd3   : > { %p3146_p12 = pnand %p3145_p3, %p3139_p11 }
  0xd5   : > { %3149 = shalt.err (!%p3146_p12)
}
  0xd6   : > { %s3150_s5 = scalar_lea.vmem %s3577_s4, 8192  ;;  %s3273_s14 = smov [#allocation5]  }
  0xd7   : > { %p3151_p13 = scmp.ne.s32.totalorder %s3577_s4, %s3150_s5  ;;  %s3155_s18 = sshll.u32 %s3273_s14, 4  ;;  %s3156_s18 = int_to_ptr.vmem [resolvable:$false] %s3155_s18 }
  0xd8   : > { %s3157_s12 = scalar_lea.vmem %s3156_s18, 16384  ;;  %p3158_p5 = scmp.lt.s32.totalorder %s3577_s4, %s3156_s18 }
  0xd9   : > { %p3153_p0 = pnand %p3151_p13, %p3107_p1  ;;  %p3159_p2 = scmp.lt.s32.totalorder %s3157_s12, %s3150_s5 }
  0xdb   : > { %p3154_p7 = pneg %p3153_p0  ;;  %p3160_p4 = por %p3159_p2, %p3158_p5 }
  0xdd   : > { %p3161_p9 = pnand %p3160_p4, %p3154_p7 }
  0xdf   : > { %3164 = shalt.err (!%p3161_p9)
}
  0xe0   : > { %2666 = dma.hbm_to_vmem [thread:$0]  (!%p3534_p10), %s3541_s15, 8192, %s3577_s4, %s3580_s2, %s4202_s17, %s4202_s17, %s4209_s11  }
  0xe1   : > { %p4210_p1 = scmp.ne.s32.totalorder %s4194_s8, 0 }
  0xe2   : > { %s3612_s3 = sand.u32 (!%p4210_p1), 1, %s3247_s25  }
  0xe3   : > { %356 = sbr.rel (%p4210_p1) target bundleno = 1080 (0x438), region = 48  ;;  %s3615_s13 = sshll.u32 (!%p4210_p1), %s3612_s3, 9 }
  0xe4   : > { %s359_s16 = scalar_lea.sflag (!%p4210_p1), [#allocation3], %s3612_s3  ;;  %s3619_s9 = scalar_lea.vmem (!%p4210_p1), [#allocation2], %s3615_s13 }
  0xea   : > { %3218 = dma.done.wait (%p3504_p6), %s359_s16, 8192  }
  0xeb   : > { %3220 = vsyncadd (%p3504_p6), %s359_s16, 4294959104  ;;  %s367_s4 = sand.u32 1, %s3348_s30   ;;  %s3627_s17 = scalar_lea.vmem [#allocation5], %s3615_s13 }
  0xec   : > { %s368_s8 = scalar_lea.sflag [#allocation6], %s367_s4 }
  0xed   : > { %3222 = dma.done.wait (%p3504_p6), %s368_s8, 8192  }
  0xee   : > { %3224 = vsyncadd (%p3504_p6), %s368_s8, 4294959104  ;;  %p4211_p10 = scmp.eq.s32.totalorder %s3348_s30, 0 }
  0xf0   : > { %3226 = dma.done.wait (%p4211_p10), [#allocation6], 8192   ;;  %p4212_p11 = pmov %p4211_p10 }
  0xf1   : > { %p4213_p8 = pmov %p4211_p10 }
  0xf2   : > { %3228 = vsyncadd (%p4212_p11), [#allocation6], 4294959104 }
  0xf3   : > { %3230 = dma.done.wait (%p4213_p8), [#allocation9], 8224   ;;  %p4214_p3 = pmov %p4213_p8 }
  0xf5   : > { %3232 = vsyncadd (%p4214_p3), [#allocation9], 4294959072  ;;  %p4215_p12 = pmov %p4214_p3 }
  0xf6   : > { %p4216_p13 = pmov %p4214_p3 }
  0xf7   : > { %3234 = dma.done.wait (%p4215_p12), [#allocation12], 8224  }
  0xf8   : > { %3236 = vsyncadd (%p4216_p13), [#allocation12], 4294959072  ;;  %v626_v0 = vld [vmem:[#allocation7 + $0x8] sm:$0xff]  ;;  %v628_v1 = vld [vmem:[#allocation7 + $0x18] sm:$0xff]  ;;  %s4050_s30 = scalar_lea.vmem [#allocation14], %s3615_s13  ;;  %s2393_s19 = sshll.u32 %s3255_s27, 13 }
  0xf9   : > { %v625_v2 = vld [vmem:[#allocation7] sm:$0xff]  ;;  %v2394_v3 = vpack.c.bf16 %v628_v1, %v626_v0  ;;  %v627_v4 = vld [vmem:[#allocation7 + $0x10] sm:$0xff]  ;;  %v630_v5 = vld [vmem:[#allocation7 + $0x28] sm:$0xff]  ;;  %s2205_s15 = sshll.u32 %s4050_s30, 4  ;;  %s4217_s6 = sld [smem:[#allocation26_spill]]  ;;  %s4121_s15 = int_to_ptr.vmem [resolvable:$true] %s2205_s15 }
  0xfa   : > { %v632_v6 = vld [vmem:[#allocation7 + $0x38] sm:$0xff]  ;;  %v2396_v7 = vpack.c.bf16 %v627_v4, %v625_v2  ;;  %v629_v9 = vld [vmem:[#allocation7 + $0x20] sm:$0xff]  ;;  %v631_v10 = vld [vmem:[#allocation7 + $0x30] sm:$0xff]  ;;  %s2192_s27 = scalar_lea.sflag [#allocation4], %s3612_s3  ;;  %s3165_s7 = scalar_lea.vmem %s4121_s15, 8192 }
  0xfb   : > { %v2398_v8 = vpack.c.bf16 %v632_v6, %v630_v5  ;;  %v634_v11 = vld [vmem:[#allocation7 + $0x48] sm:$0xff]  ;;  %2395 = vmatprep.subr.bf16.mxu0 %v2394_v3  ;;  %2586 = vmatprep.subr.bf16.mxu1 %v2394_v3  ;;  %v636_v12 = vld [vmem:[#allocation7 + $0x58] sm:$0xff]  ;;  %v2400_v13 = vpack.c.bf16 %v631_v10, %v629_v9  ;;  %v633_v15 = vld [vmem:[#allocation7 + $0x40] sm:$0xff]  ;;  %p3166_p6 = scmp.ne.s32.totalorder %s4121_s15, %s3165_s7  ;;  %p4218_p0 = scmp.ne.s32.totalorder %s4206_s20, 0 }
  0xfc   : > { %2397 = vmatpush1.bf16.msra.mxu0 %v2396_v7  ;;  %2602 = vmatpush1.bf16.msra.mxu1 %v2396_v7  ;;  %v2402_v14 = vpack.c.bf16 %v636_v12, %v634_v11  ;;  %v635_v16 = vld [vmem:[#allocation7 + $0x50] sm:$0xff]  ;;  %v638_v17 = vld [vmem:[#allocation7 + $0x68] sm:$0xff]  ;;  %v640_v18 = vld [vmem:[#allocation7 + $0x78] sm:$0xff]  ;;  %s3274_s5 = smov [#allocation14]  }
  0xfd   : > { %2399 = vmatprep.subr.bf16.mxu0 %v2398_v8  ;;  %2587 = vmatprep.subr.bf16.mxu1 %v2398_v8  ;;  %v2404_v19 = vpack.c.bf16 %v635_v16, %v633_v15  ;;  %v2406_v20 = vpack.c.bf16 %v640_v18, %v638_v17  ;;  %v637_v21 = vld [vmem:[#allocation7 + $0x60] sm:$0xff]  ;;  %v639_v22 = vld [vmem:[#allocation7 + $0x70] sm:$0xff]  ;;  %v642_v23 = vld [vmem:[#allocation7 + $0x88] sm:$0xff]  ;;  %p3167_p7 = pnand %p3166_p6, %p4218_p0  ;;  %s3169_s14 = sshll.u32 %s3274_s5, 4  ;;  %s3170_s14 = int_to_ptr.vmem [resolvable:$false] %s3169_s14 }
  0xfe   : > { %v644_v24 = vld [vmem:[#allocation7 + $0x98] sm:$0xff]  ;;  %v2408_v25 = vpack.c.bf16 %v639_v22, %v637_v21  ;;  %v641_v27 = vld [vmem:[#allocation7 + $0x80] sm:$0xff]  ;;  %v643_v28 = vld [vmem:[#allocation7 + $0x90] sm:$0xff]  ;;  %s3171_s18 = scalar_lea.vmem %s3170_s14, 16384  ;;  %p3172_p2 = scmp.lt.s32.totalorder %s4121_s15, %s3170_s14 }
  0xff   : > { %v2410_v26 = vpack.c.bf16 %v644_v24, %v642_v23  ;;  %v646_v29 = vld [vmem:[#allocation7 + $0xa8] sm:$0xff]  ;;  %v648_v30 = vld [vmem:[#allocation7 + $0xb8] sm:$0xff]  ;;  %v2412_v31 = vpack.c.bf16 %v643_v28, %v641_v27  ;;  %v645_v33 = vld [vmem:[#allocation7 + $0xa0] sm:$0xff]  ;;  %s4119_s10 = scalar_lea.hbm %s4217_s6, %s2393_s19  ;;  %p3168_p5 = pneg %p3167_p7 }
 0x100   : > { %2401 = vmatpush1.bf16.msra.mxu0 %v2400_v13  ;;  %2603 = vmatpush1.bf16.msra.mxu1 %v2400_v13  ;;  %v2414_v32 = vpack.c.bf16 %v648_v30, %v646_v29  ;;  %v647_v34 = vld [vmem:[#allocation7 + $0xb0] sm:$0xff]  ;;  %v650_v35 = vld [vmem:[#allocation7 + $0xc8] sm:$0xff]  ;;  %v652_v36 = vld [vmem:[#allocation7 + $0xd8] sm:$0xff]  ;;  %p3173_p4 = scmp.lt.s32.totalorder %s3171_s18, %s3165_s7 }
 0x101   : > { %2403 = vmatprep.subr.bf16.mxu0 %v2402_v14  ;;  %2588 = vmatprep.subr.bf16.mxu1 %v2402_v14  ;;  %v2416_v37 = vpack.c.bf16 %v647_v34, %v645_v33  ;;  %v649_v38 = vld [vmem:[#allocation7 + $0xc0] sm:$0xff]  ;;  %v2418_v39 = vpack.c.bf16 %v652_v36, %v650_v35  ;;  %v651_v40 = vld [vmem:[#allocation7 + $0xd0] sm:$0xff]  ;;  %v498_v41 = vld [vmem:[%s3619_s9 + $0x8] sm:$0xff] }
 0x102   : > { %v530_v42 = vld [vmem:[%s3619_s9 + $0x108] sm:$0xff]  ;;  %v656_v44 = vld [vmem:[#allocation7 + $0xf8] sm:$0xff]  ;;  %765 = vmatprep.mubr.f32.mxu0 %v498_v41  ;;  %v2420_v45 = vpack.c.bf16 %v651_v40, %v649_v38  ;;  %v653_v47 = vld [vmem:[#allocation7 + $0xe0] sm:$0xff]  ;;  %p3174_p9 = por %p3173_p4, %p3172_p2 }
 0x103   : > { %v654_v43 = vld [vmem:[#allocation7 + $0xe8] sm:$0xff]  ;;  %861 = vmatprep.mubr.f32.mxu1 %v530_v42  ;;  %v655_v48 = vld [vmem:[#allocation7 + $0xf0] sm:$0xff]  ;;  %v660_v50 = vld [vmem:[#allocation7 + $0x118] sm:$0xff] }
 0x104   : > { %2405 = vmatpush1.bf16.msra.mxu0 %v2404_v19  ;;  %2604 = vmatpush1.bf16.msra.mxu1 %v2404_v19  ;;  %v2422_v46 = vpack.c.bf16 %v656_v44, %v654_v43  ;;  %v658_v49 = vld [vmem:[#allocation7 + $0x108] sm:$0xff]  ;;  %v2424_v51 = vpack.c.bf16 %v655_v48, %v653_v47  ;;  %v657_v53 = vld [vmem:[#allocation7 + $0x100] sm:$0xff]  ;;  %v659_v54 = vld [vmem:[#allocation7 + $0x110] sm:$0xff]  ;;  %p3175_p1 = pnand %p3174_p9, %p3168_p5 }
 0x105   : > { %2407 = vmatprep.subr.bf16.mxu0 %v2406_v20  ;;  %2589 = vmatprep.subr.bf16.mxu1 %v2406_v20  ;;  %v2426_v52 = vpack.c.bf16 %v660_v50, %v658_v49  ;;  %v662_v55 = vld [vmem:[#allocation7 + $0x128] sm:$0xff]  ;;  %v664_v56 = vld [vmem:[#allocation7 + $0x138] sm:$0xff]  ;;  %v2428_v57 = vpack.c.bf16 %v659_v54, %v657_v53  ;;  %v661_v59 = vld [vmem:[#allocation7 + $0x120] sm:$0xff] }
 0x106   : > { %v2430_v58 = vpack.c.bf16 %v664_v56, %v662_v55  ;;  %v663_v60 = vld [vmem:[#allocation7 + $0x130] sm:$0xff]  ;;  %v666_v61 = vld [vmem:[#allocation7 + $0x148] sm:$0xff]  ;;  %v668_v62 = vld [vmem:[#allocation7 + $0x158] sm:$0xff] }
 0x107   : > { %v2432_v63 = vpack.c.bf16 %v663_v60, %v661_v59  ;;  %v2434_v0 = vpack.c.bf16 %v668_v62, %v666_v61  ;;  %v665_v1 = vld [vmem:[#allocation7 + $0x140] sm:$0xff]  ;;  %v667_v2 = vld [vmem:[#allocation7 + $0x150] sm:$0xff]  ;;  %v670_v3 = vld [vmem:[#allocation7 + $0x168] sm:$0xff] }
 0x108   : > { %2409 = vmatpush1.bf16.msra.mxu0 %v2408_v25  ;;  %2605 = vmatpush1.bf16.msra.mxu1 %v2408_v25  ;;  %v672_v4 = vld [vmem:[#allocation7 + $0x178] sm:$0xff]  ;;  %v2436_v5 = vpack.c.bf16 %v667_v2, %v665_v1  ;;  %v669_v7 = vld [vmem:[#allocation7 + $0x160] sm:$0xff]  ;;  %v671_v8 = vld [vmem:[#allocation7 + $0x170] sm:$0xff] }
 0x109   : > { %2411 = vmatprep.subr.bf16.mxu0 %v2410_v26  ;;  %2590 = vmatprep.subr.bf16.mxu1 %v2410_v26  ;;  %v2438_v6 = vpack.c.bf16 %v672_v4, %v670_v3  ;;  %v674_v9 = vld [vmem:[#allocation7 + $0x188] sm:$0xff]  ;;  %v676_v10 = vld [vmem:[#allocation7 + $0x198] sm:$0xff]  ;;  %v2440_v11 = vpack.c.bf16 %v671_v8, %v669_v7  ;;  %v673_v13 = vld [vmem:[#allocation7 + $0x180] sm:$0xff] }
 0x10a   : > { %v2442_v12 = vpack.c.bf16 %v676_v10, %v674_v9  ;;  %v675_v14 = vld [vmem:[#allocation7 + $0x190] sm:$0xff]  ;;  %v678_v15 = vld [vmem:[#allocation7 + $0x1a8] sm:$0xff]  ;;  %v680_v16 = vld [vmem:[#allocation7 + $0x1b8] sm:$0xff] }
 0x10b   : > { %v2444_v17 = vpack.c.bf16 %v675_v14, %v673_v13  ;;  %v2446_v18 = vpack.c.bf16 %v680_v16, %v678_v15  ;;  %v677_v19 = vld [vmem:[#allocation7 + $0x1a0] sm:$0xff]  ;;  %v679_v20 = vld [vmem:[#allocation7 + $0x1b0] sm:$0xff]  ;;  %v682_v21 = vld [vmem:[#allocation7 + $0x1c8] sm:$0xff] }
 0x10c   : > { %2413 = vmatpush1.bf16.msra.mxu0 %v2412_v31  ;;  %2606 = vmatpush1.bf16.msra.mxu1 %v2412_v31  ;;  %v684_v22 = vld [vmem:[#allocation7 + $0x1d8] sm:$0xff]  ;;  %v2448_v23 = vpack.c.bf16 %v679_v20, %v677_v19  ;;  %v681_v25 = vld [vmem:[#allocation7 + $0x1c0] sm:$0xff]  ;;  %v683_v26 = vld [vmem:[#allocation7 + $0x1d0] sm:$0xff] }
 0x10d   : > { %2415 = vmatprep.subr.bf16.mxu0 %v2414_v32  ;;  %2591 = vmatprep.subr.bf16.mxu1 %v2414_v32  ;;  %v2450_v24 = vpack.c.bf16 %v684_v22, %v682_v21  ;;  %v686_v27 = vld [vmem:[#allocation7 + $0x1e8] sm:$0xff]  ;;  %v688_v28 = vld [vmem:[#allocation7 + $0x1f8] sm:$0xff]  ;;  %v2452_v29 = vpack.c.bf16 %v683_v26, %v681_v25  ;;  %v685_v31 = vld [vmem:[#allocation7 + $0x1e0] sm:$0xff] }
 0x10e   : > { %v2454_v30 = vpack.c.bf16 %v688_v28, %v686_v27  ;;  %v687_v32 = vld [vmem:[#allocation7 + $0x1f0] sm:$0xff]  ;;  %v959_v33 = vld [vmem:[#allocation8 + $0x8] sm:$0xff]  ;;  %v961_v34 = vld [vmem:[#allocation8 + $0x18] sm:$0xff] }
 0x10f   : > { %v2456_v35 = vpack.c.bf16 %v687_v32, %v685_v31  ;;  %v2458_v36 = vpack.c.bf16 %v961_v34, %v959_v33  ;;  %v960_v38 = vld [vmem:[#allocation8 + $0x10] sm:$0xff]  ;;  %v965_v40 = vld [vmem:[#allocation8 + $0x38] sm:$0xff]  ;;  %v497_v41 = vld [vmem:[%s3619_s9] sm:$0xff] }
 0x110   : > { %2417 = vmatpush1.bf16.msra.mxu0 %v2416_v37  ;;  %2607 = vmatpush1.bf16.msra.mxu1 %v2416_v37  ;;  %v958_v37 = vld [vmem:[#allocation8] sm:$0xff]  ;;  %v500_v44 = vld [vmem:[%s3619_s9 + $0x18] sm:$0xff]  ;;  %v964_v47 = vld [vmem:[#allocation8 + $0x30] sm:$0xff] }
 0x111   : > { %2419 = vmatprep.subr.bf16.mxu0 %v2418_v39  ;;  %2592 = vmatprep.subr.bf16.mxu1 %v2418_v39  ;;  %v963_v39 = vld [vmem:[#allocation8 + $0x28] sm:$0xff]  ;;  %v529_v42 = vld [vmem:[%s3619_s9 + $0x100] sm:$0xff]  ;;  %v2460_v43 = vpack.c.bf16 %v960_v38, %v958_v37  ;;  %v532_v48 = vld [vmem:[%s3619_s9 + $0x118] sm:$0xff] }
 0x112   : > { %v967_v49 = vld [vmem:[#allocation8 + $0x48] sm:$0xff]  ;;  %v969_v50 = vld [vmem:[#allocation8 + $0x58] sm:$0xff]  ;;  %v966_v56 = vld [vmem:[#allocation8 + $0x40] sm:$0xff] }
 0x113   : > { %v502_v54 = vld [vmem:[%s3619_s9 + $0x28] sm:$0xff]  ;;  %v2466_v55 = vpack.c.bf16 %v969_v50, %v967_v49  ;;  %v973_v60 = vld [vmem:[#allocation8 + $0x78] sm:$0xff]  ;;  %v501_v61 = vld [vmem:[%s3619_s9 + $0x20] sm:$0xff] }
 0x114   : > { %2421 = vmatpush1.bf16.msra.mxu0 %v2420_v45  ;;  %2608 = vmatpush1.bf16.msra.mxu1 %v2420_v45  ;;  %v2462_v45 = vpack.c.bf16 %v965_v40, %v963_v39  ;;  %v971_v59 = vld [vmem:[#allocation8 + $0x68] sm:$0xff]  ;;  %v533_v62 = vld [vmem:[%s3619_s9 + $0x120] sm:$0xff]  ;;  %v972_v3 = vld [vmem:[#allocation8 + $0x70] sm:$0xff] }
 0x115   : > { %2423 = vmatprep.subr.bf16.mxu0 %v2422_v46  ;;  %2593 = vmatprep.subr.bf16.mxu1 %v2422_v46  ;;  %v962_v46 = vld [vmem:[#allocation8 + $0x20] sm:$0xff]  ;;  %v2470_v1 = vpack.c.bf16 %v973_v60, %v971_v59  ;;  %v536_v4 = vld [vmem:[%s3619_s9 + $0x138] sm:$0xff]  ;;  %v503_v7 = vld [vmem:[%s3619_s9 + $0x30] sm:$0xff] }
 0x116   : > { %v2464_v53 = vpack.c.bf16 %v964_v47, %v962_v46  ;;  %v970_v2 = vld [vmem:[#allocation8 + $0x60] sm:$0xff]  ;;  %v535_v8 = vld [vmem:[%s3619_s9 + $0x130] sm:$0xff]  ;;  %v506_v10 = vld [vmem:[%s3619_s9 + $0x48] sm:$0xff] }
 0x117   : > { %v2472_v9 = vpack.c.bf16 %v972_v3, %v970_v2  ;;  %v976_v13 = vld [vmem:[#allocation8 + $0x90] sm:$0xff]  ;;  %v538_v14 = vld [vmem:[%s3619_s9 + $0x148] sm:$0xff]  ;;  %v981_v16 = vld [vmem:[#allocation8 + $0xb8] sm:$0xff] }
 0x118   : > { %2425 = vmatpush1.bf16.msra.mxu0 %v2424_v51  ;;  %2609 = vmatpush1.bf16.msra.mxu1 %v2424_v51  ;;  %v499_v51 = vld [vmem:[%s3619_s9 + $0x10] sm:$0xff]  ;;  %v979_v15 = vld [vmem:[#allocation8 + $0xa8] sm:$0xff]  ;;  %v508_v20 = vld [vmem:[%s3619_s9 + $0x58] sm:$0xff] }
 0x119   : > { %2427 = vmatprep.subr.bf16.mxu0 %v2426_v52  ;;  %2594 = vmatprep.subr.bf16.mxu1 %v2426_v52  ;;  %v531_v52 = vld [vmem:[%s3619_s9 + $0x110] sm:$0xff]  ;;  %v2478_v21 = vpack.c.bf16 %v981_v16, %v979_v15  ;;  %v978_v22 = vld [vmem:[#allocation8 + $0xa0] sm:$0xff]  ;;  %v983_v25 = vld [vmem:[#allocation8 + $0xc8] sm:$0xff] }
 0x11a   : > { %v985_v26 = vld [vmem:[#allocation8 + $0xd8] sm:$0xff]  ;;  %v507_v27 = vld [vmem:[%s3619_s9 + $0x50] sm:$0xff]  ;;  %v982_v32 = vld [vmem:[#allocation8 + $0xc0] sm:$0xff] }
 0x11b   : > { %v539_v28 = vld [vmem:[%s3619_s9 + $0x150] sm:$0xff]  ;;  %v2482_v31 = vpack.c.bf16 %v985_v26, %v983_v25  ;;  %v542_v34 = vld [vmem:[%s3619_s9 + $0x168] sm:$0xff]  ;;  %v509_v37 = vld [vmem:[%s3619_s9 + $0x60] sm:$0xff] }
 0x11c   : > { %2429 = vmatpush1.bf16.msra.mxu0 %v2428_v57  ;;  %2610 = vmatpush1.bf16.msra.mxu1 %v2428_v57  ;;  %v968_v57 = vld [vmem:[#allocation8 + $0x50] sm:$0xff]  ;;  %v541_v38 = vld [vmem:[%s3619_s9 + $0x160] sm:$0xff]  ;;  %v512_v40 = vld [vmem:[%s3619_s9 + $0x78] sm:$0xff] }
 0x11d   : > { %2431 = vmatprep.subr.bf16.mxu0 %v2430_v58  ;;  %2595 = vmatprep.subr.bf16.mxu1 %v2430_v58  ;;  %v534_v58 = vld [vmem:[%s3619_s9 + $0x128] sm:$0xff]  ;;  %v984_v33 = vld [vmem:[#allocation8 + $0xd0] sm:$0xff]  ;;  %v993_v46 = vld [vmem:[#allocation8 + $0x118] sm:$0xff] }
 0x11e   : > { %v2484_v39 = vpack.c.bf16 %v984_v33, %v982_v32  ;;  %v511_v47 = vld [vmem:[%s3619_s9 + $0x70] sm:$0xff]  ;;  %v514_v50 = vld [vmem:[%s3619_s9 + $0x88] sm:$0xff]  ;;  %v516_v60 = vld [vmem:[%s3619_s9 + $0x98] sm:$0xff] }
 0x11f   : > { %v1001_v2 = vld [vmem:[#allocation8 + $0x158] sm:$0xff]  ;;  %v515_v3 = vld [vmem:[%s3619_s9 + $0x90] sm:$0xff]  ;;  %v522_v26 = vld [vmem:[%s3619_s9 + $0xc8] sm:$0xff] }
 0x120   : > { %2433 = vmatpush1.bf16.msra.mxu0 %v2432_v63  ;;  %2611 = vmatpush1.bf16.msra.mxu1 %v2432_v63  ;;  %v2468_v63 = vpack.c.bf16 %v968_v57, %v966_v56  ;;  %v997_v56 = vld [vmem:[#allocation8 + $0x138] sm:$0xff]  ;;  %v513_v57 = vld [vmem:[%s3619_s9 + $0x80] sm:$0xff] }
 0x121   : > { %2435 = vmatprep.subr.bf16.mxu0 %v2434_v0  ;;  %2596 = vmatprep.subr.bf16.mxu1 %v2434_v0  ;;  %v504_v0 = vld [vmem:[%s3619_s9 + $0x38] sm:$0xff]  ;;  %v521_v33 = vld [vmem:[%s3619_s9 + $0xc0] sm:$0xff] }
 0x122   : > { %v520_v16 = vld [vmem:[%s3619_s9 + $0xb8] sm:$0xff] }
 0x123   : > { %v1013_v32 = vld [vmem:[#allocation8 + $0x1b8] sm:$0xff] }
 0x124   : > { %2437 = vmatpush1.bf16.msra.mxu0 %v2436_v5  ;;  %2612 = vmatpush1.bf16.msra.mxu1 %v2436_v5  ;;  %v975_v5 = vld [vmem:[#allocation8 + $0x88] sm:$0xff] }
 0x125   : > { %2439 = vmatprep.subr.bf16.mxu0 %v2438_v6  ;;  %2597 = vmatprep.subr.bf16.mxu1 %v2438_v6  ;;  %v977_v6 = vld [vmem:[#allocation8 + $0x98] sm:$0xff] }
 0x128   : > { %2441 = vmatpush1.bf16.msra.mxu0 %v2440_v11  ;;  %2613 = vmatpush1.bf16.msra.mxu1 %v2440_v11  ;;  %v2474_v11 = vpack.c.bf16 %v977_v6, %v975_v5  ;;  %v518_v6 = vld [vmem:[%s3619_s9 + $0xa8] sm:$0xff] }
 0x129   : > { %2443 = vmatprep.subr.bf16.mxu0 %v2442_v12  ;;  %2598 = vmatprep.subr.bf16.mxu1 %v2442_v12  ;;  %v974_v12 = vld [vmem:[#allocation8 + $0x80] sm:$0xff] }
 0x12a   : > { %v2476_v19 = vpack.c.bf16 %v976_v13, %v974_v12  ;;  %v1005_v12 = vld [vmem:[#allocation8 + $0x178] sm:$0xff]  ;;  %v517_v13 = vld [vmem:[%s3619_s9 + $0xa0] sm:$0xff] }
 0x12c   : > { %2445 = vmatpush1.bf16.msra.mxu0 %v2444_v17  ;;  %2614 = vmatpush1.bf16.msra.mxu1 %v2444_v17  ;;  %v505_v17 = vld [vmem:[%s3619_s9 + $0x40] sm:$0xff] }
 0x12d   : > { %2447 = vmatprep.subr.bf16.mxu0 %v2446_v18  ;;  %2599 = vmatprep.subr.bf16.mxu1 %v2446_v18  ;;  %v537_v18 = vld [vmem:[%s3619_s9 + $0x140] sm:$0xff] }
 0x130   : > { %2449 = vmatpush1.bf16.msra.mxu0 %v2448_v23  ;;  %2615 = vmatpush1.bf16.msra.mxu1 %v2448_v23  ;;  %v980_v23 = vld [vmem:[#allocation8 + $0xb0] sm:$0xff] }
 0x131   : > { %2451 = vmatprep.subr.bf16.mxu0 %v2450_v24  ;;  %2600 = vmatprep.subr.bf16.mxu1 %v2450_v24  ;;  %v540_v24 = vld [vmem:[%s3619_s9 + $0x158] sm:$0xff] }
 0x134   : > { %2453 = vmatpush1.bf16.msra.mxu0 %v2452_v29  ;;  %2616 = vmatpush1.bf16.msra.mxu1 %v2452_v29  ;;  %v2480_v29 = vpack.c.bf16 %v980_v23, %v978_v22  ;;  %v1009_v22 = vld [vmem:[#allocation8 + $0x198] sm:$0xff]  ;;  %v519_v23 = vld [vmem:[%s3619_s9 + $0xb0] sm:$0xff] }
 0x135   : > { %2455 = vmatprep.subr.bf16.mxu0 %v2454_v30  ;;  %2601 = vmatprep.subr.bf16.mxu1 %v2454_v30  ;;  %v510_v30 = vld [vmem:[%s3619_s9 + $0x68] sm:$0xff] }
 0x138   : > { %2457 = vmatpush1.bf16.msra.mxu0 %v2456_v35  ;;  %2617 = vmatpush1.bf16.msra.mxu1 %v2456_v35  ;;  %v987_v35 = vld [vmem:[#allocation8 + $0xe8] sm:$0xff] }
 0x139   : > { %2459 = vmatprep.subr.bf16.mxu1 %v2458_v36  ;;  %v989_v36 = vld [vmem:[#allocation8 + $0xf8] sm:$0xff] }
 0x13b   : > { %766 = vmatmul.mubr.f32.vlgmr.msra.gmra.mrb[0].mxu0 %v497_v41  ;;  %862 = vmatmul.mubr.f32.vlgmr.msra.gmra.mrb[0].mxu1 %v529_v42  ;;  %v2486_v41 = vpack.c.bf16 %v989_v36, %v987_v35  ;;  %v986_v42 = vld [vmem:[#allocation8 + $0xe0] sm:$0xff]  ;;  %v524_v36 = vld [vmem:[%s3619_s9 + $0xd8] sm:$0xff] }
 0x13c   : > { %2461 = vmatpush1.bf16.msra.mxu1 %v2460_v43  ;;  %771 = vmatprep.mubr.f32.mxu0 %v500_v44  ;;  %v988_v43 = vld [vmem:[#allocation8 + $0xf0] sm:$0xff]  ;;  %v544_v44 = vld [vmem:[%s3619_s9 + $0x178] sm:$0xff] }
 0x13d   : > { %867 = vmatprep.mubr.f32.mxu1 %v532_v48  ;;  %2463 = vmatprep.subr.bf16.mxu1 %v2462_v45  ;;  %v991_v45 = vld [vmem:[#allocation8 + $0x108] sm:$0xff]  ;;  %v543_v48 = vld [vmem:[%s3619_s9 + $0x170] sm:$0xff]  ;;  %v2488_v49 = vpack.c.bf16 %v988_v43, %v986_v42  ;;  %v1017_v42 = vld [vmem:[#allocation8 + $0x1d8] sm:$0xff] }
 0x13e   : > { %v523_v43 = vld [vmem:[%s3619_s9 + $0xd0] sm:$0xff] }
 0x13f   : > { %772 = vmatmul.mubr.f32.gmra.mrb[2].mxu0 %v499_v51  ;;  %868 = vmatmul.mubr.f32.gmra.mrb[2].mxu1 %v531_v52  ;;  %v2490_v51 = vpack.c.bf16 %v993_v46, %v991_v45  ;;  %v990_v52 = vld [vmem:[#allocation8 + $0x100] sm:$0xff]  ;;  %v526_v46 = vld [vmem:[%s3619_s9 + $0xe8] sm:$0xff] }
 0x140   : > { %2465 = vmatpush1.bf16.msra.mxu1 %v2464_v53  ;;  %777 = vmatprep.mubr.f32.mxu0 %v502_v54  ;;  %v992_v53 = vld [vmem:[#allocation8 + $0x110] sm:$0xff]  ;;  %v546_v54 = vld [vmem:[%s3619_s9 + $0x188] sm:$0xff] }
 0x141   : > { %873 = vmatprep.mubr.f32.mxu1 %v534_v58  ;;  %2467 = vmatprep.subr.bf16.mxu1 %v2466_v55  ;;  %v995_v55 = vld [vmem:[#allocation8 + $0x128] sm:$0xff]  ;;  %v545_v58 = vld [vmem:[%s3619_s9 + $0x180] sm:$0xff]  ;;  %v2492_v59 = vpack.c.bf16 %v992_v53, %v990_v52  ;;  %v1021_v52 = vld [vmem:[#allocation8 + $0x1f8] sm:$0xff] }
 0x142   : > { %v525_v53 = vld [vmem:[%s3619_s9 + $0xe0] sm:$0xff] }
 0x143   : > { %778 = vmatmul.mubr.f32.gmra.mrb[4].mxu0 %v501_v61  ;;  %874 = vmatmul.mubr.f32.gmra.mrb[4].mxu1 %v533_v62  ;;  %v2494_v61 = vpack.c.bf16 %v997_v56, %v995_v55  ;;  %v994_v62 = vld [vmem:[#allocation8 + $0x120] sm:$0xff]  ;;  %v528_v56 = vld [vmem:[%s3619_s9 + $0xf8] sm:$0xff] }
 0x144   : > { %2469 = vmatpush1.bf16.msra.mxu1 %v2468_v63  ;;  %783 = vmatprep.mubr.f32.mxu0 %v504_v0  ;;  %v996_v63 = vld [vmem:[#allocation8 + $0x130] sm:$0xff]  ;;  %v548_v0 = vld [vmem:[%s3619_s9 + $0x198] sm:$0xff] }
 0x145   : > { %879 = vmatprep.mubr.f32.mxu1 %v536_v4  ;;  %2471 = vmatprep.subr.bf16.mxu1 %v2470_v1  ;;  %v999_v1 = vld [vmem:[#allocation8 + $0x148] sm:$0xff]  ;;  %v547_v4 = vld [vmem:[%s3619_s9 + $0x190] sm:$0xff]  ;;  %v2496_v5 = vpack.c.bf16 %v996_v63, %v994_v62 }
 0x146   : > { %v559_v62 = vld [vmem:[%s3619_s9 + $0x1f0] sm:$0xff] }
 0x147   : > { %784 = vmatmul.mubr.f32.gmra.mrb[6].mxu0 %v503_v7  ;;  %880 = vmatmul.mubr.f32.gmra.mrb[6].mxu1 %v535_v8  ;;  %v2498_v7 = vpack.c.bf16 %v1001_v2, %v999_v1  ;;  %v998_v8 = vld [vmem:[#allocation8 + $0x140] sm:$0xff]  ;;  %v564_v2 = vld [vmem:[%s3627_s17 + $0x18] sm:$0xff] }
 0x148   : > { %2473 = vmatpush1.bf16.msra.mxu1 %v2472_v9  ;;  %789 = vmatprep.mubr.f32.mxu0 %v506_v10  ;;  %v1000_v9 = vld [vmem:[#allocation8 + $0x150] sm:$0xff]  ;;  %v550_v10 = vld [vmem:[%s3619_s9 + $0x1a8] sm:$0xff]  ;;  %v561_v1 = vld [vmem:[%s3627_s17] sm:$0xff] }
 0x149   : > { %885 = vmatprep.mubr.f32.mxu1 %v538_v14  ;;  %2475 = vmatprep.subr.bf16.mxu1 %v2474_v11  ;;  %v1003_v11 = vld [vmem:[#allocation8 + $0x168] sm:$0xff]  ;;  %v549_v14 = vld [vmem:[%s3619_s9 + $0x1a0] sm:$0xff]  ;;  %v2500_v15 = vpack.c.bf16 %v1000_v9, %v998_v8 }
 0x14a   : > { %v570_v8 = vld [vmem:[%s3627_s17 + $0x48] sm:$0xff]  ;;  %v569_v9 = vld [vmem:[%s3627_s17 + $0x40] sm:$0xff] }
 0x14b   : > { %790 = vmatmul.mubr.f32.gmra.mrb[8].mxu0 %v505_v17  ;;  %886 = vmatmul.mubr.f32.gmra.mrb[8].mxu1 %v537_v18  ;;  %v2502_v17 = vpack.c.bf16 %v1005_v12, %v1003_v11  ;;  %v1002_v18 = vld [vmem:[#allocation8 + $0x160] sm:$0xff]  ;;  %v571_v11 = vld [vmem:[%s3627_s17 + $0x50] sm:$0xff]  ;;  %v574_v12 = vld [vmem:[%s3627_s17 + $0x68] sm:$0xff] }
 0x14c   : > { %2477 = vmatpush1.bf16.msra.mxu1 %v2476_v19  ;;  %795 = vmatprep.mubr.f32.mxu0 %v508_v20  ;;  %v1004_v19 = vld [vmem:[#allocation8 + $0x170] sm:$0xff]  ;;  %v552_v20 = vld [vmem:[%s3619_s9 + $0x1b8] sm:$0xff] }
 0x14d   : > { %891 = vmatprep.mubr.f32.mxu1 %v540_v24  ;;  %2479 = vmatprep.subr.bf16.mxu1 %v2478_v21  ;;  %v1007_v21 = vld [vmem:[#allocation8 + $0x188] sm:$0xff]  ;;  %v551_v24 = vld [vmem:[%s3619_s9 + $0x1b0] sm:$0xff]  ;;  %v2504_v25 = vpack.c.bf16 %v1004_v19, %v1002_v18  ;;  %v580_v18 = vld [vmem:[%s3627_s17 + $0x98] sm:$0xff] }
 0x14e   : > { %v579_v19 = vld [vmem:[%s3627_s17 + $0x90] sm:$0xff] }
 0x14f   : > { %796 = vmatmul.mubr.f32.gmra.mrb[10].mxu0 %v507_v27  ;;  %892 = vmatmul.mubr.f32.gmra.mrb[10].mxu1 %v539_v28  ;;  %v2506_v27 = vpack.c.bf16 %v1009_v22, %v1007_v21  ;;  %v1006_v28 = vld [vmem:[#allocation8 + $0x180] sm:$0xff]  ;;  %v584_v22 = vld [vmem:[%s3627_s17 + $0xb8] sm:$0xff] }
 0x150   : > { %2481 = vmatpush1.bf16.msra.mxu1 %v2480_v29  ;;  %801 = vmatprep.mubr.f32.mxu0 %v510_v30  ;;  %v1008_v29 = vld [vmem:[#allocation8 + $0x190] sm:$0xff]  ;;  %v554_v30 = vld [vmem:[%s3619_s9 + $0x1c8] sm:$0xff]  ;;  %v581_v21 = vld [vmem:[%s3627_s17 + $0xa0] sm:$0xff] }
 0x151   : > { %897 = vmatprep.mubr.f32.mxu1 %v542_v34  ;;  %2483 = vmatprep.subr.bf16.mxu1 %v2482_v31  ;;  %v1011_v31 = vld [vmem:[#allocation8 + $0x1a8] sm:$0xff]  ;;  %v553_v34 = vld [vmem:[%s3619_s9 + $0x1c0] sm:$0xff]  ;;  %v2508_v35 = vpack.c.bf16 %v1008_v29, %v1006_v28 }
 0x152   : > { %v590_v28 = vld [vmem:[%s3627_s17 + $0xe8] sm:$0xff]  ;;  %v589_v29 = vld [vmem:[%s3627_s17 + $0xe0] sm:$0xff] }
 0x153   : > { %802 = vmatmul.mubr.f32.gmra.mrb[12].mxu0 %v509_v37  ;;  %898 = vmatmul.mubr.f32.gmra.mrb[12].mxu1 %v541_v38  ;;  %v2510_v37 = vpack.c.bf16 %v1013_v32, %v1011_v31  ;;  %v1010_v38 = vld [vmem:[#allocation8 + $0x1a0] sm:$0xff]  ;;  %v591_v31 = vld [vmem:[%s3627_s17 + $0xf0] sm:$0xff]  ;;  %v594_v32 = vld [vmem:[%s3627_s17 + $0x108] sm:$0xff] }
 0x154   : > { %2485 = vmatpush1.bf16.msra.mxu1 %v2484_v39  ;;  %807 = vmatprep.mubr.f32.mxu0 %v512_v40  ;;  %v1012_v39 = vld [vmem:[#allocation8 + $0x1b0] sm:$0xff]  ;;  %v556_v40 = vld [vmem:[%s3619_s9 + $0x1d8] sm:$0xff] }
 0x155   : > { %903 = vmatprep.mubr.f32.mxu1 %v544_v44  ;;  %2487 = vmatprep.subr.bf16.mxu1 %v2486_v41  ;;  %v1015_v41 = vld [vmem:[#allocation8 + $0x1c8] sm:$0xff]  ;;  %v555_v44 = vld [vmem:[%s3619_s9 + $0x1d0] sm:$0xff]  ;;  %v2512_v45 = vpack.c.bf16 %v1012_v39, %v1010_v38  ;;  %v600_v38 = vld [vmem:[%s3627_s17 + $0x138] sm:$0xff] }
 0x156   : > { %v599_v39 = vld [vmem:[%s3627_s17 + $0x130] sm:$0xff] }
 0x157   : > { %808 = vmatmul.mubr.f32.gmra.mrb[14].mxu0 %v511_v47  ;;  %904 = vmatmul.mubr.f32.gmra.mrb[14].mxu1 %v543_v48  ;;  %v2514_v47 = vpack.c.bf16 %v1017_v42, %v1015_v41  ;;  %v1014_v48 = vld [vmem:[#allocation8 + $0x1c0] sm:$0xff]  ;;  %v604_v42 = vld [vmem:[%s3627_s17 + $0x158] sm:$0xff] }
 0x158   : > { %2489 = vmatpush1.bf16.msra.mxu1 %v2488_v49  ;;  %813 = vmatprep.mubr.f32.mxu0 %v514_v50  ;;  %v1016_v49 = vld [vmem:[#allocation8 + $0x1d0] sm:$0xff]  ;;  %v558_v50 = vld [vmem:[%s3619_s9 + $0x1e8] sm:$0xff]  ;;  %v601_v41 = vld [vmem:[%s3627_s17 + $0x140] sm:$0xff] }
 0x159   : > { %909 = vmatprep.mubr.f32.mxu1 %v546_v54  ;;  %2491 = vmatprep.subr.bf16.mxu1 %v2490_v51  ;;  %v1019_v51 = vld [vmem:[#allocation8 + $0x1e8] sm:$0xff]  ;;  %v557_v54 = vld [vmem:[%s3619_s9 + $0x1e0] sm:$0xff]  ;;  %v2516_v55 = vpack.c.bf16 %v1016_v49, %v1014_v48 }
 0x15a   : > { %v610_v48 = vld [vmem:[%s3627_s17 + $0x188] sm:$0xff]  ;;  %v609_v49 = vld [vmem:[%s3627_s17 + $0x180] sm:$0xff] }
 0x15b   : > { %814 = vmatmul.mubr.f32.gmra.mrb[16].mxu0 %v513_v57  ;;  %910 = vmatmul.mubr.f32.gmra.mrb[16].mxu1 %v545_v58  ;;  %v2518_v57 = vpack.c.bf16 %v1021_v52, %v1019_v51  ;;  %v1018_v58 = vld [vmem:[#allocation8 + $0x1e0] sm:$0xff]  ;;  %v611_v51 = vld [vmem:[%s3627_s17 + $0x190] sm:$0xff]  ;;  %v614_v52 = vld [vmem:[%s3627_s17 + $0x1a8] sm:$0xff] }
 0x15c   : > { %2493 = vmatpush1.bf16.msra.mxu1 %v2492_v59  ;;  %819 = vmatprep.mubr.f32.mxu0 %v516_v60  ;;  %v1020_v59 = vld [vmem:[#allocation8 + $0x1f0] sm:$0xff]  ;;  %v560_v60 = vld [vmem:[%s3619_s9 + $0x1f8] sm:$0xff] }
 0x15d   : > { %915 = vmatprep.mubr.f32.mxu1 %v548_v0  ;;  %2495 = vmatprep.subr.bf16.mxu1 %v2494_v61  ;;  %v527_v61 = vld [vmem:[%s3619_s9 + $0xf0] sm:$0xff]  ;;  %v2520_v63 = vpack.c.bf16 %v1020_v59, %v1018_v58  ;;  %v562_v0 = vld [vmem:[%s3627_s17 + $0x8] sm:$0xff]  ;;  %v620_v58 = vld [vmem:[%s3627_s17 + $0x1d8] sm:$0xff] }
 0x15e   : > { %v619_v59 = vld [vmem:[%s3627_s17 + $0x1d0] sm:$0xff] }
 0x15f   : > { %820 = vmatmul.mubr.f32.gmra.mrb[18].mxu0 %v515_v3  ;;  %916 = vmatmul.mubr.f32.gmra.mrb[18].mxu1 %v547_v4  ;;  %v563_v3 = vld [vmem:[%s3627_s17 + $0x10] sm:$0xff]  ;;  %v566_v4 = vld [vmem:[%s3627_s17 + $0x28] sm:$0xff] }
 0x160   : > { %2497 = vmatpush1.bf16.msra.mxu1 %v2496_v5  ;;  %825 = vmatprep.mubr.f32.mxu0 %v518_v6  ;;  %v565_v5 = vld [vmem:[%s3627_s17 + $0x20] sm:$0xff]  ;;  %v568_v6 = vld [vmem:[%s3627_s17 + $0x38] sm:$0xff] }
 0x161   : > { %921 = vmatprep.mubr.f32.mxu1 %v550_v10  ;;  %2499 = vmatprep.subr.bf16.mxu1 %v2498_v7  ;;  %v567_v7 = vld [vmem:[%s3627_s17 + $0x30] sm:$0xff]  ;;  %v572_v10 = vld [vmem:[%s3627_s17 + $0x58] sm:$0xff] }
 0x163   : > { %826 = vmatmul.mubr.f32.gmra.mrb[20].mxu0 %v517_v13  ;;  %922 = vmatmul.mubr.f32.gmra.mrb[20].mxu1 %v549_v14  ;;  %v573_v13 = vld [vmem:[%s3627_s17 + $0x60] sm:$0xff]  ;;  %v576_v14 = vld [vmem:[%s3627_s17 + $0x78] sm:$0xff] }
 0x164   : > { %2501 = vmatpush1.bf16.msra.mxu1 %v2500_v15  ;;  %831 = vmatprep.mubr.f32.mxu0 %v520_v16  ;;  %v575_v15 = vld [vmem:[%s3627_s17 + $0x70] sm:$0xff]  ;;  %v578_v16 = vld [vmem:[%s3627_s17 + $0x88] sm:$0xff] }
 0x165   : > { %927 = vmatprep.mubr.f32.mxu1 %v552_v20  ;;  %2503 = vmatprep.subr.bf16.mxu1 %v2502_v17  ;;  %v577_v17 = vld [vmem:[%s3627_s17 + $0x80] sm:$0xff]  ;;  %v582_v20 = vld [vmem:[%s3627_s17 + $0xa8] sm:$0xff] }
 0x167   : > { %832 = vmatmul.mubr.f32.gmra.mrb[22].mxu0 %v519_v23  ;;  %928 = vmatmul.mubr.f32.gmra.mrb[22].mxu1 %v551_v24  ;;  %v583_v23 = vld [vmem:[%s3627_s17 + $0xb0] sm:$0xff]  ;;  %v586_v24 = vld [vmem:[%s3627_s17 + $0xc8] sm:$0xff] }
 0x168   : > { %2505 = vmatpush1.bf16.msra.mxu1 %v2504_v25  ;;  %837 = vmatprep.mubr.f32.mxu0 %v522_v26  ;;  %v585_v25 = vld [vmem:[%s3627_s17 + $0xc0] sm:$0xff]  ;;  %v588_v26 = vld [vmem:[%s3627_s17 + $0xd8] sm:$0xff] }
 0x169   : > { %933 = vmatprep.mubr.f32.mxu1 %v554_v30  ;;  %2507 = vmatprep.subr.bf16.mxu1 %v2506_v27  ;;  %v587_v27 = vld [vmem:[%s3627_s17 + $0xd0] sm:$0xff]  ;;  %v592_v30 = vld [vmem:[%s3627_s17 + $0xf8] sm:$0xff] }
 0x16b   : > { %838 = vmatmul.mubr.f32.gmra.mrb[24].mxu0 %v521_v33  ;;  %934 = vmatmul.mubr.f32.gmra.mrb[24].mxu1 %v553_v34  ;;  %v593_v33 = vld [vmem:[%s3627_s17 + $0x100] sm:$0xff]  ;;  %v596_v34 = vld [vmem:[%s3627_s17 + $0x118] sm:$0xff] }
 0x16c   : > { %2509 = vmatpush1.bf16.msra.mxu1 %v2508_v35  ;;  %843 = vmatprep.mubr.f32.mxu0 %v524_v36  ;;  %v595_v35 = vld [vmem:[%s3627_s17 + $0x110] sm:$0xff]  ;;  %v598_v36 = vld [vmem:[%s3627_s17 + $0x128] sm:$0xff] }
 0x16d   : > { %939 = vmatprep.mubr.f32.mxu1 %v556_v40  ;;  %2511 = vmatprep.subr.bf16.mxu1 %v2510_v37  ;;  %v597_v37 = vld [vmem:[%s3627_s17 + $0x120] sm:$0xff]  ;;  %v602_v40 = vld [vmem:[%s3627_s17 + $0x148] sm:$0xff] }
 0x16f   : > { %844 = vmatmul.mubr.f32.gmra.mrb[26].mxu0 %v523_v43  ;;  %940 = vmatmul.mubr.f32.gmra.mrb[26].mxu1 %v555_v44  ;;  %v603_v43 = vld [vmem:[%s3627_s17 + $0x150] sm:$0xff]  ;;  %v606_v44 = vld [vmem:[%s3627_s17 + $0x168] sm:$0xff] }
 0x170   : > { %2513 = vmatpush1.bf16.msra.mxu1 %v2512_v45  ;;  %849 = vmatprep.mubr.f32.mxu0 %v526_v46  ;;  %v605_v45 = vld [vmem:[%s3627_s17 + $0x160] sm:$0xff]  ;;  %v608_v46 = vld [vmem:[%s3627_s17 + $0x178] sm:$0xff] }
 0x171   : > { %945 = vmatprep.mubr.f32.mxu1 %v558_v50  ;;  %2515 = vmatprep.subr.bf16.mxu1 %v2514_v47  ;;  %v607_v47 = vld [vmem:[%s3627_s17 + $0x170] sm:$0xff]  ;;  %v612_v50 = vld [vmem:[%s3627_s17 + $0x198] sm:$0xff] }
 0x173   : > { %850 = vmatmul.mubr.f32.gmra.mrb[28].mxu0 %v525_v53  ;;  %946 = vmatmul.mubr.f32.gmra.mrb[28].mxu1 %v557_v54  ;;  %v613_v53 = vld [vmem:[%s3627_s17 + $0x1a0] sm:$0xff]  ;;  %v616_v54 = vld [vmem:[%s3627_s17 + $0x1b8] sm:$0xff] }
 0x174   : > { %2517 = vmatpush1.bf16.msra.mxu1 %v2516_v55  ;;  %855 = vmatprep.mubr.f32.mxu0 %v528_v56  ;;  %v615_v55 = vld [vmem:[%s3627_s17 + $0x1b0] sm:$0xff]  ;;  %v618_v56 = vld [vmem:[%s3627_s17 + $0x1c8] sm:$0xff] }
 0x175   : > { %951 = vmatprep.mubr.f32.mxu1 %v560_v60  ;;  %2519 = vmatprep.subr.bf16.mxu1 %v2518_v57  ;;  %v617_v57 = vld [vmem:[%s3627_s17 + $0x1c0] sm:$0xff]  ;;  %v622_v60 = vld [vmem:[%s3627_s17 + $0x1e8] sm:$0xff] }
 0x177   : > { %856 = vmatmul.mubr.f32.gmra.mrb[30].mxu0 %v527_v61  ;;  %952 = vmatmul.mubr.f32.gmra.mrb[30].mxu1 %v559_v62  ;;  %v621_v61 = vld [vmem:[%s3627_s17 + $0x1e0] sm:$0xff]  ;;  %v624_v62 = vld [vmem:[%s3627_s17 + $0x1f8] sm:$0xff] }
 0x178   : > { %2521 = vmatpush1.bf16.msra.mxu1 %v2520_v63  ;;  %1098 = vmatprep.mubr.f32.mxu1 %v562_v0  ;;  %v623_v63 = vld [vmem:[%s3627_s17 + $0x1f0] sm:$0xff]  ;;  %v691_v0 = vlaneseq }
 0x17b   : > { %1099 = vmatmul.mubr.f32.vlgmr.msra.gmra.mrb[32].mxu1 %v561_v1  ;;  %v3773_v1 = vshrl.u32 %v691_v0, 7 }
 0x17c   : > { %1104 = vmatprep.mubr.f32.mxu1 %v564_v2 }
 0x17d   : > { %v693_v2 = vsub.s32 0, %v3773_v1 }
 0x17f   : > { %1105 = vmatmul.mubr.f32.gmra.mrb[34].mxu1 %v563_v3  ;;  %v689_v3 = vld [vmem:[#allocation10] sm:$0x3] }
 0x180   : > { %1110 = vmatprep.mubr.f32.mxu1 %v566_v4  ;;  %v697_v4 = vsub.s32 1, %v3773_v1 }
 0x183   : > { %1111 = vmatmul.mubr.f32.gmra.mrb[36].mxu1 %v565_v5  ;;  %v3779_v5 = vrot.slane %v689_v3, %v693_v2 }
 0x184   : > { %1116 = vmatprep.mubr.f32.mxu1 %v568_v6  ;;  %v3783_v6 = vrot.slane %v689_v3, %v697_v4 }
 0x187   : > { %1117 = vmatmul.mubr.f32.gmra.mrb[38].mxu1 %v567_v7 }
 0x188   : > { %1122 = vmatprep.mubr.f32.mxu1 %v570_v8 }
 0x18b   : > { %1123 = vmatmul.mubr.f32.gmra.mrb[40].mxu1 %v569_v9 }
 0x18c   : > { %1128 = vmatprep.mubr.f32.mxu1 %v572_v10 }
 0x18f   : > { %1129 = vmatmul.mubr.f32.gmra.mrb[42].mxu1 %v571_v11 }
 0x190   : > { %1134 = vmatprep.mubr.f32.mxu1 %v574_v12 }
 0x193   : > { %1135 = vmatmul.mubr.f32.gmra.mrb[44].mxu1 %v573_v13 }
 0x194   : > { %1140 = vmatprep.mubr.f32.mxu1 %v576_v14 }
 0x197   : > { %1141 = vmatmul.mubr.f32.gmra.mrb[46].mxu1 %v575_v15 }
 0x198   : > { %1146 = vmatprep.mubr.f32.mxu1 %v578_v16 }
 0x19b   : > { %1147 = vmatmul.mubr.f32.gmra.mrb[48].mxu1 %v577_v17 }
 0x19c   : > { %1152 = vmatprep.mubr.f32.mxu1 %v580_v18 }
 0x19f   : > { %1153 = vmatmul.mubr.f32.gmra.mrb[50].mxu1 %v579_v19 }
 0x1a0   : > { %1158 = vmatprep.mubr.f32.mxu1 %v582_v20 }
 0x1a3   : > { %1159 = vmatmul.mubr.f32.gmra.mrb[52].mxu1 %v581_v21 }
 0x1a4   : > { %1164 = vmatprep.mubr.f32.mxu1 %v584_v22 }
 0x1a7   : > { %1165 = vmatmul.mubr.f32.gmra.mrb[54].mxu1 %v583_v23 }
 0x1a8   : > { %1170 = vmatprep.mubr.f32.mxu1 %v586_v24 }
 0x1ab   : > { %1171 = vmatmul.mubr.f32.gmra.mrb[56].mxu1 %v585_v25 }
 0x1ac   : > { %1176 = vmatprep.mubr.f32.mxu1 %v588_v26 }
 0x1af   : > { %1177 = vmatmul.mubr.f32.gmra.mrb[58].mxu1 %v587_v27 }
 0x1b0   : > { %1182 = vmatprep.mubr.f32.mxu1 %v590_v28 }
 0x1b3   : > { %1183 = vmatmul.mubr.f32.gmra.mrb[60].mxu1 %v589_v29 }
 0x1b4   : > { %1188 = vmatprep.mubr.f32.mxu1 %v592_v30 }
 0x1b7   : > { %1189 = vmatmul.mubr.f32.gmra.mrb[62].mxu1 %v591_v31 }
 0x1b8   : > { %1194 = vmatprep.mubr.f32.mxu1 %v594_v32 }
 0x1bb   : > { %1195 = vmatmul.mubr.f32.gmra.mrb[64].mxu1 %v593_v33 }
 0x1bc   : > { %1200 = vmatprep.mubr.f32.mxu1 %v596_v34 }
 0x1bf   : > { %1201 = vmatmul.mubr.f32.gmra.mrb[66].mxu1 %v595_v35 }
 0x1c0   : > { %1206 = vmatprep.mubr.f32.mxu1 %v598_v36 }
 0x1c3   : > { %1207 = vmatmul.mubr.f32.gmra.mrb[68].mxu1 %v597_v37 }
 0x1c4   : > { %1212 = vmatprep.mubr.f32.mxu1 %v600_v38 }
 0x1c7   : > { %1213 = vmatmul.mubr.f32.gmra.mrb[70].mxu1 %v599_v39 }
 0x1c8   : > { %1218 = vmatprep.mubr.f32.mxu1 %v602_v40 }
 0x1cb   : > { %1219 = vmatmul.mubr.f32.gmra.mrb[72].mxu1 %v601_v41 }
 0x1cc   : > { %1224 = vmatprep.mubr.f32.mxu1 %v604_v42 }
 0x1cf   : > { %1225 = vmatmul.mubr.f32.gmra.mrb[74].mxu1 %v603_v43 }
 0x1d0   : > { %1230 = vmatprep.mubr.f32.mxu1 %v606_v44 }
 0x1d3   : > { %1231 = vmatmul.mubr.f32.gmra.mrb[76].mxu1 %v605_v45 }
 0x1d4   : > { %1236 = vmatprep.mubr.f32.mxu1 %v608_v46 }
 0x1d7   : > { %1237 = vmatmul.mubr.f32.gmra.mrb[78].mxu1 %v607_v47 }
 0x1d8   : > { %1242 = vmatprep.mubr.f32.mxu1 %v610_v48 }
 0x1db   : > { %1243 = vmatmul.mubr.f32.gmra.mrb[80].mxu1 %v609_v49 }
 0x1dc   : > { %1248 = vmatprep.mubr.f32.mxu1 %v612_v50 }
 0x1df   : > { %1249 = vmatmul.mubr.f32.gmra.mrb[82].mxu1 %v611_v51 }
 0x1e0   : > { %1254 = vmatprep.mubr.f32.mxu1 %v614_v52 }
 0x1e3   : > { %1255 = vmatmul.mubr.f32.gmra.mrb[84].mxu1 %v613_v53 }
 0x1e4   : > { %1260 = vmatprep.mubr.f32.mxu1 %v616_v54 }
 0x1e7   : > { %1261 = vmatmul.mubr.f32.gmra.mrb[86].mxu1 %v615_v55 }
 0x1e8   : > { %1266 = vmatprep.mubr.f32.mxu1 %v618_v56 }
 0x1eb   : > { %1267 = vmatmul.mubr.f32.gmra.mrb[88].mxu1 %v617_v57 }
 0x1ec   : > { %1272 = vmatprep.mubr.f32.mxu1 %v620_v58 }
 0x1ef   : > { %1273 = vmatmul.mubr.f32.gmra.mrb[90].mxu1 %v619_v59 }
 0x1f0   : > { %1278 = vmatprep.mubr.f32.mxu1 %v622_v60 }
 0x1f3   : > { %1279 = vmatmul.mubr.f32.gmra.mrb[92].mxu1 %v621_v61 }
 0x1f4   : > { %1284 = vmatprep.mubr.f32.mxu1 %v624_v62 }
 0x1f7   : > { %1285 = vmatmul.mubr.f32.gmra.mrb[94].mxu1 %v623_v63 }
 0x20e   : > { %v767_v7 = vpop.f32.mrb[0].mxu0  ;;  %v863_v8 = vpop.f32.mrb[0].mxu1 }
 0x20f   : > { %v768_v9 = vadd.f32 %v767_v7, %v3779_v5  ;;  %v864_v10 = vadd.f32 %v863_v8, %v3779_v5  ;;  %v769_v11 = vpop.f32.mrb[1].mxu0  ;;  %v865_v12 = vpop.f32.mrb[1].mxu1 }
 0x210   : > { %v770_v13 = vadd.f32 %v769_v11, %v3783_v6  ;;  %v866_v14 = vadd.f32 %v865_v12, %v3783_v6 }
 0x211   : > { %v2741_v15 = vpack.i.bf16 %v768_v9, %v864_v10 }
 0x212   : > { %v773_v16 = vpop.f32.mrb[2].mxu0  ;;  %v869_v17 = vpop.f32.mrb[2].mxu1  ;;  %v2853_v18 = vpack.i.bf16 %v770_v13, %v866_v14 }
 0x213   : > { %v774_v19 = vadd.f32 %v773_v16, %v3779_v5  ;;  %v870_v20 = vadd.f32 %v869_v17, %v3779_v5  ;;  %v775_v21 = vpop.f32.mrb[3].mxu0  ;;  %v871_v22 = vpop.f32.mrb[3].mxu1  ;;  %2742 = vxpose.xlu0.b32.start [1/16] %v2741_v15, 128 }
 0x214   : > { %v776_v23 = vadd.f32 %v775_v21, %v3783_v6  ;;  %v872_v24 = vadd.f32 %v871_v22, %v3783_v6  ;;  %2854 = vxpose.xlu1.b32.start [1/16] %v2853_v18, 128 }
 0x215   : > { %v2743_v25 = vpack.i.bf16 %v774_v19, %v870_v20 }
 0x216   : > { %v779_v26 = vpop.f32.mrb[4].mxu0  ;;  %v875_v27 = vpop.f32.mrb[4].mxu1  ;;  %v2855_v28 = vpack.i.bf16 %v776_v23, %v872_v24 }
 0x217   : > { %v780_v29 = vadd.f32 %v779_v26, %v3779_v5  ;;  %v876_v30 = vadd.f32 %v875_v27, %v3779_v5  ;;  %v781_v31 = vpop.f32.mrb[5].mxu0  ;;  %v877_v32 = vpop.f32.mrb[5].mxu1  ;;  %2744 = vxpose.xlu0.b32.cont [2/16] %v2743_v25, 128 }
 0x218   : > { %v782_v33 = vadd.f32 %v781_v31, %v3783_v6  ;;  %v878_v34 = vadd.f32 %v877_v32, %v3783_v6  ;;  %2856 = vxpose.xlu1.b32.cont [2/16] %v2855_v28, 128 }
 0x219   : > { %v2745_v35 = vpack.i.bf16 %v780_v29, %v876_v30 }
 0x21a   : > { %v785_v36 = vpop.f32.mrb[6].mxu0  ;;  %v881_v37 = vpop.f32.mrb[6].mxu1  ;;  %v2857_v38 = vpack.i.bf16 %v782_v33, %v878_v34 }
 0x21b   : > { %v786_v39 = vadd.f32 %v785_v36, %v3779_v5  ;;  %v882_v40 = vadd.f32 %v881_v37, %v3779_v5  ;;  %v787_v41 = vpop.f32.mrb[7].mxu0  ;;  %v883_v42 = vpop.f32.mrb[7].mxu1  ;;  %2746 = vxpose.xlu0.b32.cont [3/16] %v2745_v35, 128 }
 0x21c   : > { %v788_v43 = vadd.f32 %v787_v41, %v3783_v6  ;;  %v884_v44 = vadd.f32 %v883_v42, %v3783_v6  ;;  %2858 = vxpose.xlu1.b32.cont [3/16] %v2857_v38, 128 }
 0x21d   : > { %v2747_v45 = vpack.i.bf16 %v786_v39, %v882_v40 }
 0x21e   : > { %v791_v46 = vpop.f32.mrb[8].mxu0  ;;  %v887_v47 = vpop.f32.mrb[8].mxu1  ;;  %v2859_v48 = vpack.i.bf16 %v788_v43, %v884_v44 }
 0x21f   : > { %v792_v49 = vadd.f32 %v791_v46, %v3779_v5  ;;  %v888_v50 = vadd.f32 %v887_v47, %v3779_v5  ;;  %v793_v51 = vpop.f32.mrb[9].mxu0  ;;  %v889_v52 = vpop.f32.mrb[9].mxu1  ;;  %2748 = vxpose.xlu0.b32.cont [4/16] %v2747_v45, 128 }
 0x220   : > { %v794_v53 = vadd.f32 %v793_v51, %v3783_v6  ;;  %v890_v54 = vadd.f32 %v889_v52, %v3783_v6  ;;  %2860 = vxpose.xlu1.b32.cont [4/16] %v2859_v48, 128 }
 0x221   : > { %v2749_v55 = vpack.i.bf16 %v792_v49, %v888_v50 }
 0x222   : > { %v797_v56 = vpop.f32.mrb[10].mxu0  ;;  %v893_v57 = vpop.f32.mrb[10].mxu1  ;;  %v2861_v58 = vpack.i.bf16 %v794_v53, %v890_v54 }
 0x223   : > { %v798_v59 = vadd.f32 %v797_v56, %v3779_v5  ;;  %v894_v60 = vadd.f32 %v893_v57, %v3779_v5  ;;  %v799_v61 = vpop.f32.mrb[11].mxu0  ;;  %v895_v62 = vpop.f32.mrb[11].mxu1  ;;  %2750 = vxpose.xlu0.b32.cont [5/16] %v2749_v55, 128 }
 0x224   : > { %v800_v63 = vadd.f32 %v799_v61, %v3783_v6  ;;  %v896_v0 = vadd.f32 %v895_v62, %v3783_v6  ;;  %2862 = vxpose.xlu1.b32.cont [5/16] %v2861_v58, 128 }
 0x225   : > { %v2751_v3 = vpack.i.bf16 %v798_v59, %v894_v60 }
 0x226   : > { %v803_v7 = vpop.f32.mrb[12].mxu0  ;;  %v899_v8 = vpop.f32.mrb[12].mxu1  ;;  %v2863_v9 = vpack.i.bf16 %v800_v63, %v896_v0 }
 0x227   : > { %v804_v10 = vadd.f32 %v803_v7, %v3779_v5  ;;  %v900_v11 = vadd.f32 %v899_v8, %v3779_v5  ;;  %v805_v12 = vpop.f32.mrb[13].mxu0  ;;  %v901_v13 = vpop.f32.mrb[13].mxu1  ;;  %2752 = vxpose.xlu0.b32.cont [6/16] %v2751_v3, 128 }
 0x228   : > { %v806_v14 = vadd.f32 %v805_v12, %v3783_v6  ;;  %v902_v15 = vadd.f32 %v901_v13, %v3783_v6  ;;  %2864 = vxpose.xlu1.b32.cont [6/16] %v2863_v9, 128 }
 0x229   : > { %v2753_v16 = vpack.i.bf16 %v804_v10, %v900_v11 }
 0x22a   : > { %v809_v17 = vpop.f32.mrb[14].mxu0  ;;  %v905_v18 = vpop.f32.mrb[14].mxu1  ;;  %v2865_v19 = vpack.i.bf16 %v806_v14, %v902_v15 }
 0x22b   : > { %v810_v20 = vadd.f32 %v809_v17, %v3779_v5  ;;  %v906_v21 = vadd.f32 %v905_v18, %v3779_v5  ;;  %v811_v22 = vpop.f32.mrb[15].mxu0  ;;  %v907_v23 = vpop.f32.mrb[15].mxu1  ;;  %2754 = vxpose.xlu0.b32.cont [7/16] %v2753_v16, 128 }
 0x22c   : > { %v812_v24 = vadd.f32 %v811_v22, %v3783_v6  ;;  %v908_v25 = vadd.f32 %v907_v23, %v3783_v6  ;;  %2866 = vxpose.xlu1.b32.cont [7/16] %v2865_v19, 128 }
 0x22d   : > { %v2755_v26 = vpack.i.bf16 %v810_v20, %v906_v21 }
 0x22e   : > { %v815_v27 = vpop.f32.mrb[16].mxu0  ;;  %v911_v28 = vpop.f32.mrb[16].mxu1  ;;  %v2867_v29 = vpack.i.bf16 %v812_v24, %v908_v25 }
 0x22f   : > { %v816_v30 = vadd.f32 %v815_v27, %v3779_v5  ;;  %v912_v31 = vadd.f32 %v911_v28, %v3779_v5  ;;  %v817_v32 = vpop.f32.mrb[17].mxu0  ;;  %v913_v33 = vpop.f32.mrb[17].mxu1  ;;  %2756 = vxpose.xlu0.b32.cont [8/16] %v2755_v26, 128 }
 0x230   : > { %v818_v34 = vadd.f32 %v817_v32, %v3783_v6  ;;  %v914_v35 = vadd.f32 %v913_v33, %v3783_v6  ;;  %2868 = vxpose.xlu1.b32.cont [8/16] %v2867_v29, 128 }
 0x231   : > { %v2757_v36 = vpack.i.bf16 %v816_v30, %v912_v31 }
 0x232   : > { %v821_v37 = vpop.f32.mrb[18].mxu0  ;;  %v917_v38 = vpop.f32.mrb[18].mxu1  ;;  %v2869_v39 = vpack.i.bf16 %v818_v34, %v914_v35 }
 0x233   : > { %v822_v40 = vadd.f32 %v821_v37, %v3779_v5  ;;  %v918_v41 = vadd.f32 %v917_v38, %v3779_v5  ;;  %v823_v42 = vpop.f32.mrb[19].mxu0  ;;  %v919_v43 = vpop.f32.mrb[19].mxu1  ;;  %2758 = vxpose.xlu0.b32.cont [9/16] %v2757_v36, 128 }
 0x234   : > { %v824_v44 = vadd.f32 %v823_v42, %v3783_v6  ;;  %v920_v45 = vadd.f32 %v919_v43, %v3783_v6  ;;  %2870 = vxpose.xlu1.b32.cont [9/16] %v2869_v39, 128 }
 0x235   : > { %v2759_v46 = vpack.i.bf16 %v822_v40, %v918_v41 }
 0x236   : > { %v827_v47 = vpop.f32.mrb[20].mxu0  ;;  %v923_v48 = vpop.f32.mrb[20].mxu1  ;;  %v2871_v49 = vpack.i.bf16 %v824_v44, %v920_v45 }
 0x237   : > { %v828_v50 = vadd.f32 %v827_v47, %v3779_v5  ;;  %v924_v51 = vadd.f32 %v923_v48, %v3779_v5  ;;  %v829_v52 = vpop.f32.mrb[21].mxu0  ;;  %v925_v53 = vpop.f32.mrb[21].mxu1  ;;  %2760 = vxpose.xlu0.b32.cont [10/16] %v2759_v46, 128  ;;  %v1022_v47 = vld [vmem:[#allocation11] sm:$0x3] }
 0x238   : > { %v830_v54 = vadd.f32 %v829_v52, %v3783_v6  ;;  %v926_v55 = vadd.f32 %v925_v53, %v3783_v6  ;;  %2872 = vxpose.xlu1.b32.cont [10/16] %v2871_v49, 128 }
 0x239   : > { %v2761_v56 = vpack.i.bf16 %v828_v50, %v924_v51  ;;  %v3851_v51 = vrot.slane %v1022_v47, %v693_v2 }
 0x23a   : > { %v833_v57 = vpop.f32.mrb[22].mxu0  ;;  %v929_v58 = vpop.f32.mrb[22].mxu1  ;;  %v2873_v59 = vpack.i.bf16 %v830_v54, %v926_v55 }
 0x23b   : > { %v834_v60 = vadd.f32 %v833_v57, %v3779_v5  ;;  %v930_v61 = vadd.f32 %v929_v58, %v3779_v5  ;;  %v835_v62 = vpop.f32.mrb[23].mxu0  ;;  %v931_v63 = vpop.f32.mrb[23].mxu1  ;;  %2762 = vxpose.xlu0.b32.cont [11/16] %v2761_v56, 128 }
 0x23c   : > { %v836_v0 = vadd.f32 %v835_v62, %v3783_v6  ;;  %v932_v3 = vadd.f32 %v931_v63, %v3783_v6  ;;  %2874 = vxpose.xlu1.b32.cont [11/16] %v2873_v59, 128 }
 0x23d   : > { %v2763_v7 = vpack.i.bf16 %v834_v60, %v930_v61 }
 0x23e   : > { %v839_v8 = vpop.f32.mrb[24].mxu0  ;;  %v935_v9 = vpop.f32.mrb[24].mxu1  ;;  %v2875_v10 = vpack.i.bf16 %v836_v0, %v932_v3 }
 0x23f   : > { %v840_v11 = vadd.f32 %v839_v8, %v3779_v5  ;;  %v936_v12 = vadd.f32 %v935_v9, %v3779_v5  ;;  %v841_v13 = vpop.f32.mrb[25].mxu0  ;;  %v937_v14 = vpop.f32.mrb[25].mxu1  ;;  %2764 = vxpose.xlu0.b32.cont [12/16] %v2763_v7, 128 }
 0x240   : > { %v842_v15 = vadd.f32 %v841_v13, %v3783_v6  ;;  %v938_v16 = vadd.f32 %v937_v14, %v3783_v6  ;;  %2876 = vxpose.xlu1.b32.cont [12/16] %v2875_v10, 128 }
 0x241   : > { %v2765_v17 = vpack.i.bf16 %v840_v11, %v936_v12 }
 0x242   : > { %v845_v18 = vpop.f32.mrb[26].mxu0  ;;  %v941_v19 = vpop.f32.mrb[26].mxu1  ;;  %v2877_v20 = vpack.i.bf16 %v842_v15, %v938_v16 }
 0x243   : > { %v846_v21 = vadd.f32 %v845_v18, %v3779_v5  ;;  %v942_v22 = vadd.f32 %v941_v19, %v3779_v5  ;;  %v847_v23 = vpop.f32.mrb[27].mxu0  ;;  %v943_v24 = vpop.f32.mrb[27].mxu1  ;;  %2766 = vxpose.xlu0.b32.cont [13/16] %v2765_v17, 128 }
 0x244   : > { %v848_v25 = vadd.f32 %v847_v23, %v3783_v6  ;;  %v944_v26 = vadd.f32 %v943_v24, %v3783_v6  ;;  %2878 = vxpose.xlu1.b32.cont [13/16] %v2877_v20, 128 }
 0x245   : > { %v2767_v27 = vpack.i.bf16 %v846_v21, %v942_v22 }
 0x246   : > { %v851_v28 = vpop.f32.mrb[28].mxu0  ;;  %v947_v29 = vpop.f32.mrb[28].mxu1  ;;  %v2879_v30 = vpack.i.bf16 %v848_v25, %v944_v26 }
 0x247   : > { %v852_v31 = vadd.f32 %v851_v28, %v3779_v5  ;;  %v948_v32 = vadd.f32 %v947_v29, %v3779_v5  ;;  %v853_v33 = vpop.f32.mrb[29].mxu0  ;;  %v949_v34 = vpop.f32.mrb[29].mxu1  ;;  %2768 = vxpose.xlu0.b32.cont [14/16] %v2767_v27, 128 }
 0x248   : > { %v854_v35 = vadd.f32 %v853_v33, %v3783_v6  ;;  %v950_v36 = vadd.f32 %v949_v34, %v3783_v6  ;;  %2880 = vxpose.xlu1.b32.cont [14/16] %v2879_v30, 128 }
 0x249   : > { %v2769_v37 = vpack.i.bf16 %v852_v31, %v948_v32 }
 0x24a   : > { %v857_v38 = vpop.f32.mrb[30].mxu0  ;;  %v953_v39 = vpop.f32.mrb[30].mxu1  ;;  %v2881_v40 = vpack.i.bf16 %v854_v35, %v950_v36 }
 0x24b   : > { %v858_v41 = vadd.f32 %v857_v38, %v3779_v5  ;;  %v954_v42 = vadd.f32 %v953_v39, %v3779_v5  ;;  %v859_v43 = vpop.f32.mrb[31].mxu0  ;;  %v955_v44 = vpop.f32.mrb[31].mxu1  ;;  %2770 = vxpose.xlu0.b32.cont [15/16] %v2769_v37, 128  ;;  %v3855_v5 = vrot.slane %v1022_v47, %v697_v4 }
 0x24c   : > { %v860_v45 = vadd.f32 %v859_v43, %v3783_v6  ;;  %v956_v46 = vadd.f32 %v955_v44, %v3783_v6  ;;  %2882 = vxpose.xlu1.b32.cont [15/16] %v2881_v40, 128 }
 0x24d   : > { %v2771_v48 = vpack.i.bf16 %v858_v41, %v954_v42 }
 0x24e   : > { %v1100_v49 = vpop.f32.mrb[32].mxu1  ;;  %v2883_v50 = vpack.i.bf16 %v860_v45, %v956_v46 }
 0x24f   : > { %v1102_v52 = vpop.f32.mrb[33].mxu1  ;;  %2772 = vxpose.xlu0.b32.end [16/16] %v2771_v48, 128  ;;  %v1101_v54 = vadd.f32 %v1100_v49, %v3851_v51 }
 0x250   : > { %2884 = vxpose.xlu1.b32.end [16/16] %v2883_v50, 128  ;;  %v1103_v56 = vadd.f32 %v1102_v52, %v3855_v5 }
 0x252   : > { %v1106_v53 = vpop.f32.mrb[34].mxu1 }
 0x253   : > { %v1107_v6 = vadd.f32 %v1106_v53, %v3851_v51  ;;  %v1108_v55 = vpop.f32.mrb[35].mxu1 }
 0x254   : > { %v1109_v57 = vadd.f32 %v1108_v55, %v3855_v5 }
 0x255   : > { %v2524_v58 = vpack.c.bf16 %v1107_v6, %v1101_v54 }
 0x256   : > { %v2522_v2 = vpack.c.bf16 %v1109_v57, %v1103_v56  ;;  %v1112_v59 = vpop.f32.mrb[36].mxu1 }
 0x257   : > { %v1114_v60 = vpop.f32.mrb[37].mxu1  ;;  %v1113_v4 = vadd.f32 %v1112_v59, %v3851_v51 }
 0x258   : > { %2523 = vmatprep.subr.bf16.mxu0 %v2522_v2  ;;  %v1115_v63 = vadd.f32 %v1114_v60, %v3855_v5 }
 0x259   : > { %2525 = vmatpush1.bf16.msra.mxu0 %v2524_v58 }
 0x25a   : > { %v1118_v1 = vpop.f32.mrb[38].mxu1 }
 0x25b   : > { %v1119_v61 = vadd.f32 %v1118_v1, %v3851_v51  ;;  %v1120_v62 = vpop.f32.mrb[39].mxu1 }
 0x25c   : > { %v1121_v0 = vadd.f32 %v1120_v62, %v3855_v5 }
 0x25d   : > { %v2528_v3 = vpack.c.bf16 %v1119_v61, %v1113_v4 }
 0x25e   : > { %v2526_v7 = vpack.c.bf16 %v1121_v0, %v1115_v63  ;;  %v1124_v8 = vpop.f32.mrb[40].mxu1 }
 0x25f   : > { %v1126_v9 = vpop.f32.mrb[41].mxu1  ;;  %v1125_v11 = vadd.f32 %v1124_v8, %v3851_v51 }
 0x260   : > { %2527 = vmatprep.subr.bf16.mxu0 %v2526_v7  ;;  %v1127_v14 = vadd.f32 %v1126_v9, %v3855_v5 }
 0x261   : > { %2529 = vmatpush1.bf16.msra.mxu0 %v2528_v3 }
 0x262   : > { %v1130_v10 = vpop.f32.mrb[42].mxu1 }
 0x263   : > { %v1131_v12 = vadd.f32 %v1130_v10, %v3851_v51  ;;  %v1132_v13 = vpop.f32.mrb[43].mxu1 }
 0x264   : > { %v1133_v15 = vadd.f32 %v1132_v13, %v3855_v5 }
 0x265   : > { %v2532_v16 = vpack.c.bf16 %v1131_v12, %v1125_v11 }
 0x266   : > { %v2530_v17 = vpack.c.bf16 %v1133_v15, %v1127_v14  ;;  %v1136_v18 = vpop.f32.mrb[44].mxu1 }
 0x267   : > { %v1138_v19 = vpop.f32.mrb[45].mxu1  ;;  %v1137_v21 = vadd.f32 %v1136_v18, %v3851_v51 }
 0x268   : > { %2531 = vmatprep.subr.bf16.mxu0 %v2530_v17  ;;  %v1139_v24 = vadd.f32 %v1138_v19, %v3855_v5 }
 0x269   : > { %2533 = vmatpush1.bf16.msra.mxu0 %v2532_v16 }
 0x26a   : > { %v1142_v20 = vpop.f32.mrb[46].mxu1 }
 0x26b   : > { %v1143_v22 = vadd.f32 %v1142_v20, %v3851_v51  ;;  %v1144_v23 = vpop.f32.mrb[47].mxu1 }
 0x26c   : > { %v1145_v25 = vadd.f32 %v1144_v23, %v3855_v5 }
 0x26d   : > { %v2536_v26 = vpack.c.bf16 %v1143_v22, %v1137_v21 }
 0x26e   : > { %v2534_v27 = vpack.c.bf16 %v1145_v25, %v1139_v24  ;;  %v1148_v28 = vpop.f32.mrb[48].mxu1 }
 0x26f   : > { %v1150_v29 = vpop.f32.mrb[49].mxu1  ;;  %v1149_v31 = vadd.f32 %v1148_v28, %v3851_v51 }
 0x270   : > { %2535 = vmatprep.subr.bf16.mxu0 %v2534_v27  ;;  %v1151_v34 = vadd.f32 %v1150_v29, %v3855_v5 }
 0x271   : > { %2537 = vmatpush1.bf16.msra.mxu0 %v2536_v26 }
 0x272   : > { %v1154_v30 = vpop.f32.mrb[50].mxu1 }
 0x273   : > { %v1155_v32 = vadd.f32 %v1154_v30, %v3851_v51  ;;  %v1156_v33 = vpop.f32.mrb[51].mxu1 }
 0x274   : > { %v1157_v35 = vadd.f32 %v1156_v33, %v3855_v5 }
 0x275   : > { %v2540_v36 = vpack.c.bf16 %v1155_v32, %v1149_v31 }
 0x276   : > { %v2538_v37 = vpack.c.bf16 %v1157_v35, %v1151_v34  ;;  %v1160_v38 = vpop.f32.mrb[52].mxu1 }
 0x277   : > { %v1162_v39 = vpop.f32.mrb[53].mxu1  ;;  %v1161_v41 = vadd.f32 %v1160_v38, %v3851_v51 }
 0x278   : > { %2539 = vmatprep.subr.bf16.mxu0 %v2538_v37  ;;  %v1163_v44 = vadd.f32 %v1162_v39, %v3855_v5 }
 0x279   : > { %2541 = vmatpush1.bf16.msra.mxu0 %v2540_v36 }
 0x27a   : > { %v1166_v40 = vpop.f32.mrb[54].mxu1 }
 0x27b   : > { %v1167_v42 = vadd.f32 %v1166_v40, %v3851_v51  ;;  %v1168_v43 = vpop.f32.mrb[55].mxu1 }
 0x27c   : > { %v1169_v45 = vadd.f32 %v1168_v43, %v3855_v5 }
 0x27d   : > { %v2544_v46 = vpack.c.bf16 %v1167_v42, %v1161_v41 }
 0x27e   : > { %v2542_v47 = vpack.c.bf16 %v1169_v45, %v1163_v44  ;;  %v1172_v48 = vpop.f32.mrb[56].mxu1 }
 0x27f   : > { %v1174_v49 = vpop.f32.mrb[57].mxu1  ;;  %v1173_v52 = vadd.f32 %v1172_v48, %v3851_v51 }
 0x280   : > { %2543 = vmatprep.subr.bf16.mxu0 %v2542_v47  ;;  %v1175_v6 = vadd.f32 %v1174_v49, %v3855_v5 }
 0x281   : > { %2545 = vmatpush1.bf16.msra.mxu0 %v2544_v46 }
 0x282   : > { %v1178_v50 = vpop.f32.mrb[58].mxu1 }
 0x283   : > { %v1179_v53 = vadd.f32 %v1178_v50, %v3851_v51  ;;  %v1180_v54 = vpop.f32.mrb[59].mxu1 }
 0x284   : > { %v1181_v55 = vadd.f32 %v1180_v54, %v3855_v5 }
 0x285   : > { %v2548_v56 = vpack.c.bf16 %v1179_v53, %v1173_v52 }
 0x286   : > { %v2546_v57 = vpack.c.bf16 %v1181_v55, %v1175_v6  ;;  %v1184_v58 = vpop.f32.mrb[60].mxu1 }
 0x287   : > { %v1186_v2 = vpop.f32.mrb[61].mxu1  ;;  %v1185_v60 = vadd.f32 %v1184_v58, %v3851_v51 }
 0x288   : > { %2547 = vmatprep.subr.bf16.mxu0 %v2546_v57  ;;  %v1187_v61 = vadd.f32 %v1186_v2, %v3855_v5 }
 0x289   : > { %2549 = vmatpush1.bf16.msra.mxu0 %v2548_v56 }
 0x28a   : > { %v1190_v59 = vpop.f32.mrb[62].mxu1 }
 0x28b   : > { %v1191_v1 = vadd.f32 %v1190_v59, %v3851_v51  ;;  %v1192_v4 = vpop.f32.mrb[63].mxu1 }
 0x28c   : > { %v1193_v62 = vadd.f32 %v1192_v4, %v3855_v5 }
 0x28d   : > { %v2552_v63 = vpack.c.bf16 %v1191_v1, %v1185_v60 }
 0x28e   : > { %v2550_v0 = vpack.c.bf16 %v1193_v62, %v1187_v61  ;;  %v1196_v3 = vpop.f32.mrb[64].mxu1 }
 0x28f   : > { %v1198_v7 = vpop.f32.mrb[65].mxu1  ;;  %v1197_v9 = vadd.f32 %v1196_v3, %v3851_v51 }
 0x290   : > { %2551 = vmatprep.subr.bf16.mxu0 %v2550_v0  ;;  %v1199_v13 = vadd.f32 %v1198_v7, %v3855_v5 }
 0x291   : > { %2553 = vmatpush1.bf16.msra.mxu0 %v2552_v63 }
 0x292   : > { %v1202_v8 = vpop.f32.mrb[66].mxu1 }
 0x293   : > { %v1203_v10 = vadd.f32 %v1202_v8, %v3851_v51  ;;  %v1204_v11 = vpop.f32.mrb[67].mxu1  ;;  %v3891_v12 = vpop.trf.xlu0 }
 0x294   : > { %v1205_v14 = vadd.f32 %v1204_v11, %v3855_v5  ;;  %v3895_v15 = vpop.trf.xlu1  ;;  %v2774_v17 = vunpack.i.l.bf16 %v3891_v12 }
 0x295   : > { %v2556_v16 = vpack.c.bf16 %v1203_v10, %v1197_v9 }
 0x296   : > { %v2554_v18 = vpack.c.bf16 %v1205_v14, %v1199_v13  ;;  %v1208_v19 = vpop.f32.mrb[68].mxu1  ;;  %1547 = vmatprep.mubr.f32.mxu0 %v2774_v17 }
 0x297   : > { %v1210_v20 = vpop.f32.mrb[69].mxu1  ;;  %v3898_v21 = vpop.trf.xlu0  ;;  %v1209_v24 = vadd.f32 %v1208_v19, %v3851_v51 }
 0x298   : > { %2555 = vmatprep.subr.bf16.mxu0 %v2554_v18  ;;  %v3900_v22 = vpop.trf.xlu1  ;;  %v1211_v28 = vadd.f32 %v1210_v20, %v3855_v5 }
 0x299   : > { %2557 = vmatpush1.bf16.msra.mxu0 %v2556_v16 }
 0x29a   : > { %v1214_v23 = vpop.f32.mrb[70].mxu1 }
 0x29b   : > { %v1215_v25 = vadd.f32 %v1214_v23, %v3851_v51  ;;  %v1216_v26 = vpop.f32.mrb[71].mxu1  ;;  %v3904_v27 = vpop.trf.xlu0 }
 0x29c   : > { %v1217_v29 = vadd.f32 %v1216_v26, %v3855_v5  ;;  %v3908_v30 = vpop.trf.xlu1 }
 0x29d   : > { %v2560_v31 = vpack.c.bf16 %v1215_v25, %v1209_v24 }
 0x29e   : > { %v2558_v32 = vpack.c.bf16 %v1217_v29, %v1211_v28  ;;  %v1220_v33 = vpop.f32.mrb[72].mxu1 }
 0x29f   : > { %v1222_v34 = vpop.f32.mrb[73].mxu1  ;;  %v3910_v35 = vpop.trf.xlu0  ;;  %v1221_v38 = vadd.f32 %v1220_v33, %v3851_v51 }
 0x2a0   : > { %2559 = vmatprep.subr.bf16.mxu0 %v2558_v32  ;;  %v3912_v36 = vpop.trf.xlu1  ;;  %v1223_v42 = vadd.f32 %v1222_v34, %v3855_v5 }
 0x2a1   : > { %2561 = vmatpush1.bf16.msra.mxu0 %v2560_v31 }
 0x2a2   : > { %v1226_v37 = vpop.f32.mrb[74].mxu1 }
 0x2a3   : > { %v1227_v39 = vadd.f32 %v1226_v37, %v3851_v51  ;;  %v1228_v40 = vpop.f32.mrb[75].mxu1  ;;  %v3916_v41 = vpop.trf.xlu0 }
 0x2a4   : > { %v1229_v43 = vadd.f32 %v1228_v40, %v3855_v5  ;;  %v3920_v44 = vpop.trf.xlu1 }
 0x2a5   : > { %v2564_v45 = vpack.c.bf16 %v1227_v39, %v1221_v38 }
 0x2a6   : > { %v2562_v46 = vpack.c.bf16 %v1229_v43, %v1223_v42  ;;  %v1232_v47 = vpop.f32.mrb[76].mxu1 }
 0x2a7   : > { %v1234_v48 = vpop.f32.mrb[77].mxu1  ;;  %v3922_v49 = vpop.trf.xlu0  ;;  %v1233_v53 = vadd.f32 %v1232_v47, %v3851_v51 }
 0x2a8   : > { %2563 = vmatprep.subr.bf16.mxu0 %v2562_v46  ;;  %v3924_v50 = vpop.trf.xlu1  ;;  %v1235_v56 = vadd.f32 %v1234_v48, %v3855_v5 }
 0x2a9   : > { %2565 = vmatpush1.bf16.msra.mxu0 %v2564_v45 }
 0x2aa   : > { %v1238_v52 = vpop.f32.mrb[78].mxu1 }
 0x2ab   : > { %v1239_v54 = vadd.f32 %v1238_v52, %v3851_v51  ;;  %v1240_v6 = vpop.f32.mrb[79].mxu1  ;;  %v3928_v55 = vpop.trf.xlu0 }
 0x2ac   : > { %v1241_v57 = vadd.f32 %v1240_v6, %v3855_v5  ;;  %v3932_v58 = vpop.trf.xlu1 }
 0x2ad   : > { %v2568_v2 = vpack.c.bf16 %v1239_v54, %v1233_v53 }
 0x2ae   : > { %v2566_v59 = vpack.c.bf16 %v1241_v57, %v1235_v56  ;;  %v1244_v60 = vpop.f32.mrb[80].mxu1 }
 0x2af   : > { %v1246_v1 = vpop.f32.mrb[81].mxu1  ;;  %v3934_v4 = vpop.trf.xlu0  ;;  %v1245_v63 = vadd.f32 %v1244_v60, %v3851_v51 }
 0x2b0   : > { %2567 = vmatprep.subr.bf16.mxu0 %v2566_v59  ;;  %v3936_v61 = vpop.trf.xlu1  ;;  %v1247_v8 = vadd.f32 %v1246_v1, %v3855_v5 }
 0x2b1   : > { %2569 = vmatpush1.bf16.msra.mxu0 %v2568_v2 }
 0x2b2   : > { %v1250_v62 = vpop.f32.mrb[82].mxu1 }
 0x2b3   : > { %v1251_v0 = vadd.f32 %v1250_v62, %v3851_v51  ;;  %v1252_v3 = vpop.f32.mrb[83].mxu1  ;;  %v3940_v7 = vpop.trf.xlu0 }
 0x2b4   : > { %v1253_v9 = vadd.f32 %v1252_v3, %v3855_v5  ;;  %v3944_v10 = vpop.trf.xlu1 }
 0x2b5   : > { %v2572_v11 = vpack.c.bf16 %v1251_v0, %v1245_v63 }
 0x2b6   : > { %v2570_v13 = vpack.c.bf16 %v1253_v9, %v1247_v8  ;;  %v1256_v14 = vpop.f32.mrb[84].mxu1 }
 0x2b7   : > { %v1258_v16 = vpop.f32.mrb[85].mxu1  ;;  %v3946_v17 = vpop.trf.xlu0  ;;  %v1257_v20 = vadd.f32 %v1256_v14, %v3851_v51 }
 0x2b8   : > { %2571 = vmatprep.subr.bf16.mxu0 %v2570_v13  ;;  %v3948_v18 = vpop.trf.xlu1  ;;  %v1259_v26 = vadd.f32 %v1258_v16, %v3855_v5  ;;  %v2777_v13 = vunpack.i.h.bf16 %v3891_v12  ;;  %v2782_v16 = vunpack.i.h.bf16 %v3898_v21  ;;  %v2792_v12 = vunpack.i.h.bf16 %v3910_v35 }
 0x2b9   : > { %2573 = vmatpush1.bf16.msra.mxu0 %v2572_v11 }
 0x2ba   : > { %v1262_v19 = vpop.f32.mrb[86].mxu1 }
 0x2bb   : > { %v1263_v23 = vadd.f32 %v1262_v19, %v3851_v51  ;;  %v1264_v24 = vpop.f32.mrb[87].mxu1  ;;  %v3952_v25 = vpop.trf.xlu0  ;;  %v2787_v19 = vunpack.i.h.bf16 %v3904_v27 }
 0x2bc   : > { %v1265_v28 = vadd.f32 %v1264_v24, %v3855_v5  ;;  %v3956_v29 = vpop.trf.xlu1  ;;  %v2797_v24 = vunpack.i.h.bf16 %v3916_v41 }
 0x2bd   : > { %v2576_v31 = vpack.c.bf16 %v1263_v23, %v1257_v20  ;;  %v2789_v20 = vunpack.i.l.bf16 %v3910_v35  ;;  %v2794_v23 = vunpack.i.l.bf16 %v3916_v41  ;;  %v2809_v35 = vunpack.i.l.bf16 %v3934_v4 }
 0x2be   : > { %v2574_v32 = vpack.c.bf16 %v1265_v28, %v1259_v26  ;;  %v1268_v33 = vpop.f32.mrb[88].mxu1  ;;  %v2802_v26 = vunpack.i.h.bf16 %v3922_v49  ;;  %v2807_v28 = vunpack.i.h.bf16 %v3928_v55  ;;  %v2814_v41 = vunpack.i.l.bf16 %v3940_v7 }
 0x2bf   : > { %v1270_v34 = vpop.f32.mrb[89].mxu1  ;;  %v3958_v37 = vpop.trf.xlu0  ;;  %v1269_v40 = vadd.f32 %v1268_v33, %v3851_v51  ;;  %v2822_v33 = vunpack.i.h.bf16 %v3946_v17 }
 0x2c0   : > { %2575 = vmatprep.subr.bf16.mxu0 %v2574_v32  ;;  %v3960_v38 = vpop.trf.xlu1  ;;  %v1271_v46 = vadd.f32 %v1270_v34, %v3855_v5  ;;  %v2817_v32 = vunpack.i.h.bf16 %v3940_v7  ;;  %v2827_v34 = vunpack.i.h.bf16 %v3952_v25 }
 0x2c1   : > { %2577 = vmatpush1.bf16.msra.mxu0 %v2576_v31  ;;  %v2812_v31 = vunpack.i.h.bf16 %v3934_v4  ;;  %v2829_v4 = vunpack.i.l.bf16 %v3958_v37 }
 0x2c2   : > { %v1274_v39 = vpop.f32.mrb[90].mxu1 }
 0x2c3   : > { %v1275_v42 = vadd.f32 %v1274_v39, %v3851_v51  ;;  %v1276_v43 = vpop.f32.mrb[91].mxu1  ;;  %v3964_v45 = vpop.trf.xlu0  ;;  %v2832_v39 = vunpack.i.h.bf16 %v3958_v37 }
 0x2c4   : > { %v1277_v47 = vadd.f32 %v1276_v43, %v3855_v5  ;;  %v3968_v48 = vpop.trf.xlu1  ;;  %v2834_v7 = vunpack.i.l.bf16 %v3964_v45 }
 0x2c5   : > { %v2580_v52 = vpack.c.bf16 %v1275_v42, %v1269_v40  ;;  %v2837_v40 = vunpack.i.h.bf16 %v3964_v45  ;;  %v2886_v45 = vunpack.i.l.bf16 %v3895_v15 }
 0x2c6   : > { %v2578_v53 = vpack.c.bf16 %v1277_v47, %v1271_v46  ;;  %v1280_v54 = vpop.f32.mrb[92].mxu1  ;;  %v2889_v47 = vunpack.i.h.bf16 %v3895_v15  ;;  %v2906_v15 = vunpack.i.l.bf16 %v3920_v44 }
 0x2c7   : > { %v1282_v6 = vpop.f32.mrb[93].mxu1  ;;  %v3970_v56 = vpop.trf.xlu0  ;;  %v1281_v59 = vadd.f32 %v1280_v54, %v3851_v51  ;;  %v2896_v54 = vunpack.i.l.bf16 %v3908_v30 }
 0x2c8   : > { %2579 = vmatprep.subr.bf16.mxu0 %v2578_v53  ;;  %v3972_v57 = vpop.trf.xlu1  ;;  %v1283_v63 = vadd.f32 %v1282_v6, %v3855_v5  ;;  %v2842_v42 = vunpack.i.h.bf16 %v3970_v56  ;;  %v2894_v53 = vunpack.i.h.bf16 %v3900_v22  ;;  %v2899_v6 = vunpack.i.h.bf16 %v3908_v30 }
 0x2c9   : > { %2581 = vmatpush1.bf16.msra.mxu0 %v2580_v52  ;;  %v2891_v52 = vunpack.i.l.bf16 %v3900_v22  ;;  %v2911_v22 = vunpack.i.l.bf16 %v3924_v50  ;;  %v2916_v30 = vunpack.i.l.bf16 %v3932_v58 }
 0x2ca   : > { %v1286_v2 = vpop.f32.mrb[94].mxu1 }
 0x2cb   : > { %v1287_v60 = vadd.f32 %v1286_v2, %v3851_v51  ;;  %v1288_v1 = vpop.f32.mrb[95].mxu1  ;;  %v3976_v62 = vpop.trf.xlu0  ;;  %v2779_v51 = vunpack.i.l.bf16 %v3898_v21  ;;  %v2799_v21 = vunpack.i.l.bf16 %v3922_v49  ;;  %v2819_v49 = vunpack.i.l.bf16 %v3946_v17 }
 0x2cc   : > { %v1289_v0 = vadd.f32 %v1288_v1, %v3855_v5  ;;  %v3980_v3 = vpop.trf.xlu1  ;;  %v2784_v5 = vunpack.i.l.bf16 %v3904_v27  ;;  %v2804_v27 = vunpack.i.l.bf16 %v3928_v55  ;;  %v2824_v55 = vunpack.i.l.bf16 %v3952_v25 }
 0x2cd   : > { %v2584_v8 = vpack.c.bf16 %v1287_v60, %v1281_v59  ;;  %v2839_v17 = vunpack.i.l.bf16 %v3970_v56  ;;  %v2844_v25 = vunpack.i.l.bf16 %v3976_v62  ;;  %v2847_v43 = vunpack.i.h.bf16 %v3976_v62 }
 0x2ce   : > { %v2582_v9 = vpack.c.bf16 %v1289_v0, %v1283_v63  ;;  %v2901_v56 = vunpack.i.l.bf16 %v3912_v36  ;;  %v2904_v2 = vunpack.i.h.bf16 %v3912_v36  ;;  %v2909_v59 = vunpack.i.h.bf16 %v3920_v44 }
 0x2cf   : > { %v3982_v11 = vpop.trf.xlu0  ;;  %v2914_v60 = vunpack.i.h.bf16 %v3924_v50  ;;  %v2919_v1 = vunpack.i.h.bf16 %v3932_v58  ;;  %v2921_v36 = vunpack.i.l.bf16 %v3936_v61  ;;  %v2924_v62 = vunpack.i.h.bf16 %v3936_v61 }
 0x2d0   : > { %2583 = vmatprep.subr.bf16.mxu0 %v2582_v9  ;;  %v3985_v14 = vpop.trf.xlu1  ;;  %v2849_v37 = vunpack.i.l.bf16 %v3982_v11  ;;  %v2852_v46 = vunpack.i.h.bf16 %v3982_v11  ;;  %v2926_v44 = vunpack.i.l.bf16 %v3944_v10  ;;  %v2929_v63 = vunpack.i.h.bf16 %v3944_v10 }
 0x2d1   : > { %2585 = vmatpush1.bf16.msra.mxu0 %v2584_v8  ;;  %v2931_v50 = vunpack.i.l.bf16 %v3948_v18  ;;  %v2934_v0 = vunpack.i.h.bf16 %v3948_v18  ;;  %v2936_v58 = vunpack.i.l.bf16 %v3956_v29  ;;  %v2939_v8 = vunpack.i.h.bf16 %v3956_v29 }
 0x2d2   : > { %v2941_v61 = vunpack.i.l.bf16 %v3960_v38  ;;  %v2944_v9 = vunpack.i.h.bf16 %v3960_v38  ;;  %v2946_v10 = vunpack.i.l.bf16 %v3968_v48  ;;  %v2949_v11 = vunpack.i.h.bf16 %v3968_v48 }
 0x2d3   : > { %v2951_v18 = vunpack.i.l.bf16 %v3972_v57  ;;  %v2956_v29 = vunpack.i.l.bf16 %v3980_v3  ;;  %v2961_v38 = vunpack.i.l.bf16 %v3985_v14 }
 0x2d4   : > { %1548 = vmatmul.mubr.f32.vlgmr.msra.gmra.mrb[32].mxu0 %v2777_v13  ;;  %v2954_v13 = vunpack.i.h.bf16 %v3972_v57 }
 0x2d5   : > { %1553 = vmatprep.mubr.f32.mxu0 %v2779_v51  ;;  %v2959_v51 = vunpack.i.h.bf16 %v3980_v3  ;;  %v1938_v3 = vld [vmem:[#allocation13 + $0x18] sm:$0xff] }
 0x2d8   : > { %1554 = vmatmul.mubr.f32.gmra.mrb[34].mxu0 %v2782_v16  ;;  %v2964_v16 = vunpack.i.h.bf16 %v3985_v14 }
 0x2d9   : > { %1559 = vmatprep.mubr.f32.mxu0 %v2784_v5  ;;  %v1935_v5 = vld [vmem:[#allocation13] sm:$0xff] }
 0x2dc   : > { %1560 = vmatmul.mubr.f32.gmra.mrb[36].mxu0 %v2787_v19 }
 0x2dd   : > { %1565 = vmatprep.mubr.f32.mxu0 %v2789_v20  ;;  %v1936_v20 = vld [vmem:[#allocation13 + $0x8] sm:$0xff] }
 0x2e0   : > { %1566 = vmatmul.mubr.f32.gmra.mrb[38].mxu0 %v2792_v12 }
 0x2e1   : > { %1571 = vmatprep.mubr.f32.mxu0 %v2794_v23 }
 0x2e4   : > { %1572 = vmatmul.mubr.f32.gmra.mrb[40].mxu0 %v2797_v24  ;;  %v1937_v24 = vld [vmem:[#allocation13 + $0x10] sm:$0xff] }
 0x2e5   : > { %1577 = vmatprep.mubr.f32.mxu0 %v2799_v21 }
 0x2e8   : > { %1578 = vmatmul.mubr.f32.gmra.mrb[42].mxu0 %v2802_v26 }
 0x2e9   : > { %1583 = vmatprep.mubr.f32.mxu0 %v2804_v27 }
 0x2ec   : > { %1584 = vmatmul.mubr.f32.gmra.mrb[44].mxu0 %v2807_v28 }
 0x2ed   : > { %1589 = vmatprep.mubr.f32.mxu0 %v2809_v35 }
 0x2f0   : > { %1590 = vmatmul.mubr.f32.gmra.mrb[46].mxu0 %v2812_v31  ;;  %v1939_v31 = vld [vmem:[#allocation13 + $0x20] sm:$0xff] }
 0x2f1   : > { %1595 = vmatprep.mubr.f32.mxu0 %v2814_v41 }
 0x2f4   : > { %1596 = vmatmul.mubr.f32.gmra.mrb[48].mxu0 %v2817_v32 }
 0x2f5   : > { %1601 = vmatprep.mubr.f32.mxu0 %v2819_v49  ;;  %v1940_v49 = vld [vmem:[#allocation13 + $0x28] sm:$0xff] }
 0x2f8   : > { %1602 = vmatmul.mubr.f32.gmra.mrb[50].mxu0 %v2822_v33 }
 0x2f9   : > { %1607 = vmatprep.mubr.f32.mxu0 %v2824_v55 }
 0x2fc   : > { %1608 = vmatmul.mubr.f32.gmra.mrb[52].mxu0 %v2827_v34 }
 0x2fd   : > { %1613 = vmatprep.mubr.f32.mxu0 %v2829_v4 }
 0x300   : > { %1614 = vmatmul.mubr.f32.gmra.mrb[54].mxu0 %v2832_v39  ;;  %v1941_v39 = vld [vmem:[#allocation13 + $0x30] sm:$0xff] }
 0x301   : > { %1619 = vmatprep.mubr.f32.mxu0 %v2834_v7 }
 0x304   : > { %1620 = vmatmul.mubr.f32.gmra.mrb[56].mxu0 %v2837_v40 }
 0x305   : > { %1625 = vmatprep.mubr.f32.mxu0 %v2839_v17  ;;  %v1942_v17 = vld [vmem:[#allocation13 + $0x38] sm:$0xff] }
 0x308   : > { %1626 = vmatmul.mubr.f32.gmra.mrb[58].mxu0 %v2842_v42 }
 0x309   : > { %1631 = vmatprep.mubr.f32.mxu0 %v2844_v25 }
 0x30c   : > { %1632 = vmatmul.mubr.f32.gmra.mrb[60].mxu0 %v2847_v43 }
 0x30d   : > { %1637 = vmatprep.mubr.f32.mxu0 %v2849_v37 }
 0x310   : > { %1638 = vmatmul.mubr.f32.gmra.mrb[62].mxu0 %v2852_v46  ;;  %v1943_v46 = vld [vmem:[#allocation13 + $0x40] sm:$0xff] }
 0x311   : > { %1643 = vmatprep.mubr.f32.mxu0 %v2886_v45 }
 0x314   : > { %1644 = vmatmul.mubr.f32.gmra.mrb[64].mxu0 %v2889_v47 }
 0x315   : > { %1649 = vmatprep.mubr.f32.mxu0 %v2891_v52  ;;  %v1944_v52 = vld [vmem:[#allocation13 + $0x48] sm:$0xff] }
 0x318   : > { %1650 = vmatmul.mubr.f32.gmra.mrb[66].mxu0 %v2894_v53 }
 0x319   : > { %1655 = vmatprep.mubr.f32.mxu0 %v2896_v54 }
 0x31c   : > { %1656 = vmatmul.mubr.f32.gmra.mrb[68].mxu0 %v2899_v6 }
 0x31d   : > { %1661 = vmatprep.mubr.f32.mxu0 %v2901_v56 }
 0x320   : > { %1662 = vmatmul.mubr.f32.gmra.mrb[70].mxu0 %v2904_v2  ;;  %v1945_v2 = vld [vmem:[#allocation13 + $0x50] sm:$0xff] }
 0x321   : > { %1667 = vmatprep.mubr.f32.mxu0 %v2906_v15 }
 0x324   : > { %1668 = vmatmul.mubr.f32.gmra.mrb[72].mxu0 %v2909_v59 }
 0x325   : > { %1673 = vmatprep.mubr.f32.mxu0 %v2911_v22  ;;  %v1946_v22 = vld [vmem:[#allocation13 + $0x58] sm:$0xff] }
 0x328   : > { %1674 = vmatmul.mubr.f32.gmra.mrb[74].mxu0 %v2914_v60 }
 0x329   : > { %1679 = vmatprep.mubr.f32.mxu0 %v2916_v30 }
 0x32c   : > { %1680 = vmatmul.mubr.f32.gmra.mrb[76].mxu0 %v2919_v1 }
 0x32d   : > { %1685 = vmatprep.mubr.f32.mxu0 %v2921_v36 }
 0x330   : > { %1686 = vmatmul.mubr.f32.gmra.mrb[78].mxu0 %v2924_v62  ;;  %v1947_v62 = vld [vmem:[#allocation13 + $0x60] sm:$0xff] }
 0x331   : > { %1691 = vmatprep.mubr.f32.mxu0 %v2926_v44 }
 0x334   : > { %1692 = vmatmul.mubr.f32.gmra.mrb[80].mxu0 %v2929_v63 }
 0x335   : > { %1697 = vmatprep.mubr.f32.mxu0 %v2931_v50  ;;  %v1948_v50 = vld [vmem:[#allocation13 + $0x68] sm:$0xff] }
 0x338   : > { %1698 = vmatmul.mubr.f32.gmra.mrb[82].mxu0 %v2934_v0 }
 0x339   : > { %1703 = vmatprep.mubr.f32.mxu0 %v2936_v58 }
 0x33c   : > { %1704 = vmatmul.mubr.f32.gmra.mrb[84].mxu0 %v2939_v8 }
 0x33d   : > { %1709 = vmatprep.mubr.f32.mxu0 %v2941_v61 }
 0x340   : > { %1710 = vmatmul.mubr.f32.gmra.mrb[86].mxu0 %v2944_v9  ;;  %v1949_v9 = vld [vmem:[#allocation13 + $0x70] sm:$0xff] }
 0x341   : > { %1715 = vmatprep.mubr.f32.mxu0 %v2946_v10 }
 0x344   : > { %1716 = vmatmul.mubr.f32.gmra.mrb[88].mxu0 %v2949_v11 }
 0x345   : > { %1721 = vmatprep.mubr.f32.mxu0 %v2951_v18  ;;  %v1950_v18 = vld [vmem:[#allocation13 + $0x78] sm:$0xff] }
 0x348   : > { %1722 = vmatmul.mubr.f32.gmra.mrb[90].mxu0 %v2954_v13 }
 0x349   : > { %1727 = vmatprep.mubr.f32.mxu0 %v2956_v29 }
 0x34c   : > { %1728 = vmatmul.mubr.f32.gmra.mrb[92].mxu0 %v2959_v51 }
 0x34d   : > { %1733 = vmatprep.mubr.f32.mxu0 %v2961_v38 }
 0x350   : > { %1734 = vmatmul.mubr.f32.gmra.mrb[94].mxu0 %v2964_v16  ;;  %v1951_v16 = vld [vmem:[#allocation13 + $0x80] sm:$0xff] }
 0x3a7   : > { %v1549_v48 = vpop.f32.mrb[32].mxu0 }
 0x3a8   : > { %v1551_v19 = vpop.f32.mrb[33].mxu0  ;;  %v1999_v57 = vmul.f32 %v1935_v5, %v1549_v48 }
 0x3a9   : > { %v2000_v12 = vmul.f32 %v1936_v20, %v1551_v19  ;;  %v1952_v19 = vld [vmem:[#allocation13 + $0x88] sm:$0xff] }
 0x3aa   : > { %v2063_v21 = vmul.f32 0.125, %v1999_v57 }
 0x3ab   : > { %v1555_v23 = vpop.f32.mrb[34].mxu0  ;;  %v2064_v27 = vmul.f32 0.125, %v2000_v12 }
 0x3ac   : > { %v1557_v26 = vpop.f32.mrb[35].mxu0  ;;  %2127 = vst [vmem:[%s4050_s30] sm:$0xff] %v2063_v21  ;;  %v2001_v14 = vmul.f32 %v1937_v24, %v1555_v23  ;;  %v1953_v24 = vld [vmem:[#allocation13 + $0x90] sm:$0xff] }
 0x3ad   : > { %2128 = vst [vmem:[%s4050_s30 + $0x8] sm:$0xff] %v2064_v27  ;;  %v2002_v28 = vmul.f32 %v1938_v3, %v1557_v26  ;;  %v1954_v3 = vld [vmem:[#allocation13 + $0x98] sm:$0xff] }
 0x3ae   : > { %v2065_v41 = vmul.f32 0.125, %v2001_v14 }
 0x3af   : > { %v1561_v35 = vpop.f32.mrb[36].mxu0  ;;  %v2066_v33 = vmul.f32 0.125, %v2002_v28 }
 0x3b0   : > { %v1563_v32 = vpop.f32.mrb[37].mxu0  ;;  %2129 = vst [vmem:[%s4050_s30 + $0x10] sm:$0xff] %v2065_v41  ;;  %v2003_v55 = vmul.f32 %v1939_v31, %v1561_v35  ;;  %v1955_v31 = vld [vmem:[#allocation13 + $0xa0] sm:$0xff] }
 0x3b1   : > { %2130 = vst [vmem:[%s4050_s30 + $0x18] sm:$0xff] %v2066_v33  ;;  %v2004_v34 = vmul.f32 %v1940_v49, %v1563_v32  ;;  %v1956_v49 = vld [vmem:[#allocation13 + $0xa8] sm:$0xff] }
 0x3b2   : > { %v2067_v7 = vmul.f32 0.125, %v2003_v55 }
 0x3b3   : > { %v1567_v4 = vpop.f32.mrb[38].mxu0  ;;  %v2068_v42 = vmul.f32 0.125, %v2004_v34 }
 0x3b4   : > { %v1569_v40 = vpop.f32.mrb[39].mxu0  ;;  %2131 = vst [vmem:[%s4050_s30 + $0x20] sm:$0xff] %v2067_v7  ;;  %v2005_v25 = vmul.f32 %v1941_v39, %v1567_v4  ;;  %v1957_v39 = vld [vmem:[#allocation13 + $0xb0] sm:$0xff] }
 0x3b5   : > { %2132 = vst [vmem:[%s4050_s30 + $0x28] sm:$0xff] %v2068_v42  ;;  %v2006_v43 = vmul.f32 %v1942_v17, %v1569_v40  ;;  %v1958_v17 = vld [vmem:[#allocation13 + $0xb8] sm:$0xff] }
 0x3b6   : > { %v2069_v45 = vmul.f32 0.125, %v2005_v25 }
 0x3b7   : > { %v1573_v37 = vpop.f32.mrb[40].mxu0  ;;  %v2070_v53 = vmul.f32 0.125, %v2006_v43 }
 0x3b8   : > { %v1575_v47 = vpop.f32.mrb[41].mxu0  ;;  %2133 = vst [vmem:[%s4050_s30 + $0x30] sm:$0xff] %v2069_v45  ;;  %v2007_v54 = vmul.f32 %v1943_v46, %v1573_v37  ;;  %v1959_v46 = vld [vmem:[#allocation13 + $0xc0] sm:$0xff] }
 0x3b9   : > { %2134 = vst [vmem:[%s4050_s30 + $0x38] sm:$0xff] %v2070_v53  ;;  %v2008_v6 = vmul.f32 %v1944_v52, %v1575_v47  ;;  %v1960_v52 = vld [vmem:[#allocation13 + $0xc8] sm:$0xff] }
 0x3ba   : > { %v2071_v15 = vmul.f32 0.125, %v2007_v54 }
 0x3bb   : > { %v1579_v56 = vpop.f32.mrb[42].mxu0  ;;  %v2072_v60 = vmul.f32 0.125, %v2008_v6 }
 0x3bc   : > { %v1581_v59 = vpop.f32.mrb[43].mxu0  ;;  %2135 = vst [vmem:[%s4050_s30 + $0x40] sm:$0xff] %v2071_v15  ;;  %v2009_v30 = vmul.f32 %v1945_v2, %v1579_v56  ;;  %v1961_v2 = vld [vmem:[#allocation13 + $0xd0] sm:$0xff] }
 0x3bd   : > { %2136 = vst [vmem:[%s4050_s30 + $0x48] sm:$0xff] %v2072_v60  ;;  %v2010_v1 = vmul.f32 %v1946_v22, %v1581_v59  ;;  %v1962_v22 = vld [vmem:[#allocation13 + $0xd8] sm:$0xff] }
 0x3be   : > { %v2073_v44 = vmul.f32 0.125, %v2009_v30 }
 0x3bf   : > { %v1585_v36 = vpop.f32.mrb[44].mxu0  ;;  %v2074_v0 = vmul.f32 0.125, %v2010_v1 }
 0x3c0   : > { %v1587_v63 = vpop.f32.mrb[45].mxu0  ;;  %2137 = vst [vmem:[%s4050_s30 + $0x50] sm:$0xff] %v2073_v44  ;;  %v2011_v58 = vmul.f32 %v1947_v62, %v1585_v36  ;;  %v1963_v62 = vld [vmem:[#allocation13 + $0xe0] sm:$0xff] }
 0x3c1   : > { %2138 = vst [vmem:[%s4050_s30 + $0x58] sm:$0xff] %v2074_v0  ;;  %v2012_v8 = vmul.f32 %v1948_v50, %v1587_v63  ;;  %v1964_v50 = vld [vmem:[#allocation13 + $0xe8] sm:$0xff] }
 0x3c2   : > { %v2075_v10 = vmul.f32 0.125, %v2011_v58 }
 0x3c3   : > { %v1591_v61 = vpop.f32.mrb[46].mxu0  ;;  %v2076_v13 = vmul.f32 0.125, %v2012_v8 }
 0x3c4   : > { %v1593_v11 = vpop.f32.mrb[47].mxu0  ;;  %2139 = vst [vmem:[%s4050_s30 + $0x60] sm:$0xff] %v2075_v10  ;;  %v2013_v29 = vmul.f32 %v1949_v9, %v1591_v61  ;;  %v1965_v9 = vld [vmem:[#allocation13 + $0xf0] sm:$0xff] }
 0x3c5   : > { %2140 = vst [vmem:[%s4050_s30 + $0x68] sm:$0xff] %v2076_v13  ;;  %v2014_v51 = vmul.f32 %v1950_v18, %v1593_v11  ;;  %v1966_v18 = vld [vmem:[#allocation13 + $0xf8] sm:$0xff] }
 0x3c6   : > { %v2077_v48 = vmul.f32 0.125, %v2013_v29 }
 0x3c7   : > { %v1597_v38 = vpop.f32.mrb[48].mxu0  ;;  %v2078_v20 = vmul.f32 0.125, %v2014_v51 }
 0x3c8   : > { %v1599_v5 = vpop.f32.mrb[49].mxu0  ;;  %2141 = vst [vmem:[%s4050_s30 + $0x70] sm:$0xff] %v2077_v48  ;;  %v2015_v57 = vmul.f32 %v1951_v16, %v1597_v38  ;;  %v1967_v16 = vld [vmem:[#allocation13 + $0x100] sm:$0xff] }
 0x3c9   : > { %2142 = vst [vmem:[%s4050_s30 + $0x78] sm:$0xff] %v2078_v20  ;;  %v2016_v12 = vmul.f32 %v1952_v19, %v1599_v5  ;;  %v1968_v19 = vld [vmem:[#allocation13 + $0x108] sm:$0xff] }
 0x3ca   : > { %v2079_v21 = vmul.f32 0.125, %v2015_v57 }
 0x3cb   : > { %v1603_v23 = vpop.f32.mrb[50].mxu0  ;;  %v2080_v27 = vmul.f32 0.125, %v2016_v12 }
 0x3cc   : > { %v1605_v26 = vpop.f32.mrb[51].mxu0  ;;  %2143 = vst [vmem:[%s4050_s30 + $0x80] sm:$0xff] %v2079_v21  ;;  %v2017_v14 = vmul.f32 %v1953_v24, %v1603_v23  ;;  %v1969_v24 = vld [vmem:[#allocation13 + $0x110] sm:$0xff] }
 0x3cd   : > { %2144 = vst [vmem:[%s4050_s30 + $0x88] sm:$0xff] %v2080_v27  ;;  %v2018_v28 = vmul.f32 %v1954_v3, %v1605_v26  ;;  %v1970_v3 = vld [vmem:[#allocation13 + $0x118] sm:$0xff] }
 0x3ce   : > { %v2081_v41 = vmul.f32 0.125, %v2017_v14 }
 0x3cf   : > { %v1609_v35 = vpop.f32.mrb[52].mxu0  ;;  %v2082_v33 = vmul.f32 0.125, %v2018_v28 }
 0x3d0   : > { %v1611_v32 = vpop.f32.mrb[53].mxu0  ;;  %2145 = vst [vmem:[%s4050_s30 + $0x90] sm:$0xff] %v2081_v41  ;;  %v2019_v55 = vmul.f32 %v1955_v31, %v1609_v35  ;;  %v1971_v31 = vld [vmem:[#allocation13 + $0x120] sm:$0xff] }
 0x3d1   : > { %2146 = vst [vmem:[%s4050_s30 + $0x98] sm:$0xff] %v2082_v33  ;;  %v2020_v34 = vmul.f32 %v1956_v49, %v1611_v32  ;;  %v1972_v49 = vld [vmem:[#allocation13 + $0x128] sm:$0xff] }
 0x3d2   : > { %v2083_v7 = vmul.f32 0.125, %v2019_v55 }
 0x3d3   : > { %v1615_v4 = vpop.f32.mrb[54].mxu0  ;;  %v2084_v42 = vmul.f32 0.125, %v2020_v34 }
 0x3d4   : > { %v1617_v40 = vpop.f32.mrb[55].mxu0  ;;  %2147 = vst [vmem:[%s4050_s30 + $0xa0] sm:$0xff] %v2083_v7  ;;  %v2021_v25 = vmul.f32 %v1957_v39, %v1615_v4  ;;  %v1973_v39 = vld [vmem:[#allocation13 + $0x130] sm:$0xff] }
 0x3d5   : > { %2148 = vst [vmem:[%s4050_s30 + $0xa8] sm:$0xff] %v2084_v42  ;;  %v2022_v43 = vmul.f32 %v1958_v17, %v1617_v40  ;;  %v1974_v17 = vld [vmem:[#allocation13 + $0x138] sm:$0xff] }
 0x3d6   : > { %v2085_v45 = vmul.f32 0.125, %v2021_v25 }
 0x3d7   : > { %v1621_v37 = vpop.f32.mrb[56].mxu0  ;;  %v2086_v53 = vmul.f32 0.125, %v2022_v43 }
 0x3d8   : > { %v1623_v47 = vpop.f32.mrb[57].mxu0  ;;  %2149 = vst [vmem:[%s4050_s30 + $0xb0] sm:$0xff] %v2085_v45  ;;  %v2023_v54 = vmul.f32 %v1959_v46, %v1621_v37  ;;  %v1975_v46 = vld [vmem:[#allocation13 + $0x140] sm:$0xff] }
 0x3d9   : > { %2150 = vst [vmem:[%s4050_s30 + $0xb8] sm:$0xff] %v2086_v53  ;;  %v2024_v6 = vmul.f32 %v1960_v52, %v1623_v47  ;;  %v1976_v52 = vld [vmem:[#allocation13 + $0x148] sm:$0xff] }
 0x3da   : > { %v2087_v15 = vmul.f32 0.125, %v2023_v54 }
 0x3db   : > { %v1627_v56 = vpop.f32.mrb[58].mxu0  ;;  %v2088_v60 = vmul.f32 0.125, %v2024_v6 }
 0x3dc   : > { %v1629_v59 = vpop.f32.mrb[59].mxu0  ;;  %2151 = vst [vmem:[%s4050_s30 + $0xc0] sm:$0xff] %v2087_v15  ;;  %v2025_v30 = vmul.f32 %v1961_v2, %v1627_v56  ;;  %v1977_v2 = vld [vmem:[#allocation13 + $0x150] sm:$0xff] }
 0x3dd   : > { %2152 = vst [vmem:[%s4050_s30 + $0xc8] sm:$0xff] %v2088_v60  ;;  %v2026_v1 = vmul.f32 %v1962_v22, %v1629_v59  ;;  %v1978_v22 = vld [vmem:[#allocation13 + $0x158] sm:$0xff] }
 0x3de   : > { %v2089_v44 = vmul.f32 0.125, %v2025_v30 }
 0x3df   : > { %v1633_v36 = vpop.f32.mrb[60].mxu0  ;;  %v2090_v0 = vmul.f32 0.125, %v2026_v1 }
 0x3e0   : > { %v1635_v63 = vpop.f32.mrb[61].mxu0  ;;  %2153 = vst [vmem:[%s4050_s30 + $0xd0] sm:$0xff] %v2089_v44  ;;  %v2027_v58 = vmul.f32 %v1963_v62, %v1633_v36  ;;  %v1979_v62 = vld [vmem:[#allocation13 + $0x160] sm:$0xff] }
 0x3e1   : > { %2154 = vst [vmem:[%s4050_s30 + $0xd8] sm:$0xff] %v2090_v0  ;;  %v2028_v8 = vmul.f32 %v1964_v50, %v1635_v63  ;;  %v1980_v50 = vld [vmem:[#allocation13 + $0x168] sm:$0xff] }
 0x3e2   : > { %v2091_v10 = vmul.f32 0.125, %v2027_v58 }
 0x3e3   : > { %v1639_v61 = vpop.f32.mrb[62].mxu0  ;;  %v2092_v13 = vmul.f32 0.125, %v2028_v8 }
 0x3e4   : > { %v1641_v11 = vpop.f32.mrb[63].mxu0  ;;  %2155 = vst [vmem:[%s4050_s30 + $0xe0] sm:$0xff] %v2091_v10  ;;  %v2029_v29 = vmul.f32 %v1965_v9, %v1639_v61  ;;  %v1981_v9 = vld [vmem:[#allocation13 + $0x170] sm:$0xff] }
 0x3e5   : > { %2156 = vst [vmem:[%s4050_s30 + $0xe8] sm:$0xff] %v2092_v13  ;;  %v2030_v51 = vmul.f32 %v1966_v18, %v1641_v11  ;;  %v1982_v18 = vld [vmem:[#allocation13 + $0x178] sm:$0xff] }
 0x3e6   : > { %v2093_v48 = vmul.f32 0.125, %v2029_v29 }
 0x3e7   : > { %v1645_v38 = vpop.f32.mrb[64].mxu0  ;;  %v2094_v20 = vmul.f32 0.125, %v2030_v51 }
 0x3e8   : > { %v1647_v5 = vpop.f32.mrb[65].mxu0  ;;  %2157 = vst [vmem:[%s4050_s30 + $0xf0] sm:$0xff] %v2093_v48  ;;  %v2031_v57 = vmul.f32 %v1967_v16, %v1645_v38  ;;  %v1983_v16 = vld [vmem:[#allocation13 + $0x180] sm:$0xff] }
 0x3e9   : > { %2158 = vst [vmem:[%s4050_s30 + $0xf8] sm:$0xff] %v2094_v20  ;;  %v2032_v12 = vmul.f32 %v1968_v19, %v1647_v5  ;;  %v1984_v19 = vld [vmem:[#allocation13 + $0x188] sm:$0xff] }
 0x3ea   : > { %v2095_v21 = vmul.f32 0.125, %v2031_v57 }
 0x3eb   : > { %v1651_v23 = vpop.f32.mrb[66].mxu0  ;;  %v2096_v27 = vmul.f32 0.125, %v2032_v12 }
 0x3ec   : > { %v1653_v26 = vpop.f32.mrb[67].mxu0  ;;  %2159 = vst [vmem:[%s4050_s30 + $0x100] sm:$0xff] %v2095_v21  ;;  %v2033_v14 = vmul.f32 %v1969_v24, %v1651_v23  ;;  %v1985_v24 = vld [vmem:[#allocation13 + $0x190] sm:$0xff] }
 0x3ed   : > { %2160 = vst [vmem:[%s4050_s30 + $0x108] sm:$0xff] %v2096_v27  ;;  %v2034_v28 = vmul.f32 %v1970_v3, %v1653_v26  ;;  %v1986_v3 = vld [vmem:[#allocation13 + $0x198] sm:$0xff] }
 0x3ee   : > { %v2097_v41 = vmul.f32 0.125, %v2033_v14 }
 0x3ef   : > { %v1657_v35 = vpop.f32.mrb[68].mxu0  ;;  %v2098_v33 = vmul.f32 0.125, %v2034_v28 }
 0x3f0   : > { %v1659_v32 = vpop.f32.mrb[69].mxu0  ;;  %2161 = vst [vmem:[%s4050_s30 + $0x110] sm:$0xff] %v2097_v41  ;;  %v2035_v55 = vmul.f32 %v1971_v31, %v1657_v35  ;;  %v1987_v31 = vld [vmem:[#allocation13 + $0x1a0] sm:$0xff] }
 0x3f1   : > { %2162 = vst [vmem:[%s4050_s30 + $0x118] sm:$0xff] %v2098_v33  ;;  %v2036_v34 = vmul.f32 %v1972_v49, %v1659_v32  ;;  %v1988_v49 = vld [vmem:[#allocation13 + $0x1a8] sm:$0xff] }
 0x3f2   : > { %v2099_v7 = vmul.f32 0.125, %v2035_v55 }
 0x3f3   : > { %v1663_v4 = vpop.f32.mrb[70].mxu0  ;;  %v2100_v42 = vmul.f32 0.125, %v2036_v34 }
 0x3f4   : > { %v1665_v40 = vpop.f32.mrb[71].mxu0  ;;  %2163 = vst [vmem:[%s4050_s30 + $0x120] sm:$0xff] %v2099_v7  ;;  %v2037_v25 = vmul.f32 %v1973_v39, %v1663_v4  ;;  %v1989_v39 = vld [vmem:[#allocation13 + $0x1b0] sm:$0xff] }
 0x3f5   : > { %2164 = vst [vmem:[%s4050_s30 + $0x128] sm:$0xff] %v2100_v42  ;;  %v2038_v43 = vmul.f32 %v1974_v17, %v1665_v40  ;;  %v1990_v17 = vld [vmem:[#allocation13 + $0x1b8] sm:$0xff] }
 0x3f6   : > { %v2101_v45 = vmul.f32 0.125, %v2037_v25 }
 0x3f7   : > { %v1669_v37 = vpop.f32.mrb[72].mxu0  ;;  %v2102_v53 = vmul.f32 0.125, %v2038_v43 }
 0x3f8   : > { %v1671_v47 = vpop.f32.mrb[73].mxu0  ;;  %2165 = vst [vmem:[%s4050_s30 + $0x130] sm:$0xff] %v2101_v45  ;;  %v2039_v54 = vmul.f32 %v1975_v46, %v1669_v37  ;;  %v1991_v46 = vld [vmem:[#allocation13 + $0x1c0] sm:$0xff] }
 0x3f9   : > { %2166 = vst [vmem:[%s4050_s30 + $0x138] sm:$0xff] %v2102_v53  ;;  %v2040_v6 = vmul.f32 %v1976_v52, %v1671_v47  ;;  %v1992_v52 = vld [vmem:[#allocation13 + $0x1c8] sm:$0xff] }
 0x3fa   : > { %v2103_v15 = vmul.f32 0.125, %v2039_v54 }
 0x3fb   : > { %v1675_v56 = vpop.f32.mrb[74].mxu0  ;;  %v2104_v60 = vmul.f32 0.125, %v2040_v6 }
 0x3fc   : > { %v1677_v59 = vpop.f32.mrb[75].mxu0  ;;  %2167 = vst [vmem:[%s4050_s30 + $0x140] sm:$0xff] %v2103_v15  ;;  %v2041_v30 = vmul.f32 %v1977_v2, %v1675_v56  ;;  %v1993_v2 = vld [vmem:[#allocation13 + $0x1d0] sm:$0xff] }
 0x3fd   : > { %2168 = vst [vmem:[%s4050_s30 + $0x148] sm:$0xff] %v2104_v60  ;;  %v2042_v1 = vmul.f32 %v1978_v22, %v1677_v59  ;;  %v1994_v22 = vld [vmem:[#allocation13 + $0x1d8] sm:$0xff] }
 0x3fe   : > { %v2105_v44 = vmul.f32 0.125, %v2041_v30 }
 0x3ff   : > { %v1681_v36 = vpop.f32.mrb[76].mxu0  ;;  %v2106_v0 = vmul.f32 0.125, %v2042_v1 }
 0x400   : > { %v1683_v63 = vpop.f32.mrb[77].mxu0  ;;  %2169 = vst [vmem:[%s4050_s30 + $0x150] sm:$0xff] %v2105_v44  ;;  %v2043_v58 = vmul.f32 %v1979_v62, %v1681_v36  ;;  %v1995_v62 = vld [vmem:[#allocation13 + $0x1e0] sm:$0xff] }
 0x401   : > { %2170 = vst [vmem:[%s4050_s30 + $0x158] sm:$0xff] %v2106_v0  ;;  %v2044_v8 = vmul.f32 %v1980_v50, %v1683_v63  ;;  %v1996_v50 = vld [vmem:[#allocation13 + $0x1e8] sm:$0xff] }
 0x402   : > { %v2107_v10 = vmul.f32 0.125, %v2043_v58 }
 0x403   : > { %v1687_v61 = vpop.f32.mrb[78].mxu0  ;;  %v2108_v13 = vmul.f32 0.125, %v2044_v8 }
 0x404   : > { %v1689_v11 = vpop.f32.mrb[79].mxu0  ;;  %2171 = vst [vmem:[%s4050_s30 + $0x160] sm:$0xff] %v2107_v10  ;;  %v2045_v29 = vmul.f32 %v1981_v9, %v1687_v61  ;;  %v1997_v9 = vld [vmem:[#allocation13 + $0x1f0] sm:$0xff] }
 0x405   : > { %2172 = vst [vmem:[%s4050_s30 + $0x168] sm:$0xff] %v2108_v13  ;;  %v2046_v51 = vmul.f32 %v1982_v18, %v1689_v11  ;;  %v1998_v18 = vld [vmem:[#allocation13 + $0x1f8] sm:$0xff] }
 0x406   : > { %v2109_v48 = vmul.f32 0.125, %v2045_v29 }
 0x407   : > { %v1693_v38 = vpop.f32.mrb[80].mxu0  ;;  %v2110_v20 = vmul.f32 0.125, %v2046_v51 }
 0x408   : > { %v1695_v5 = vpop.f32.mrb[81].mxu0  ;;  %2173 = vst [vmem:[%s4050_s30 + $0x170] sm:$0xff] %v2109_v48  ;;  %v2047_v57 = vmul.f32 %v1983_v16, %v1693_v38 }
 0x409   : > { %2174 = vst [vmem:[%s4050_s30 + $0x178] sm:$0xff] %v2110_v20  ;;  %v2048_v12 = vmul.f32 %v1984_v19, %v1695_v5 }
 0x40a   : > { %v2111_v21 = vmul.f32 0.125, %v2047_v57 }
 0x40b   : > { %v1699_v23 = vpop.f32.mrb[82].mxu0  ;;  %v2112_v27 = vmul.f32 0.125, %v2048_v12 }
 0x40c   : > { %v1701_v26 = vpop.f32.mrb[83].mxu0  ;;  %2175 = vst [vmem:[%s4050_s30 + $0x180] sm:$0xff] %v2111_v21  ;;  %v2049_v14 = vmul.f32 %v1985_v24, %v1699_v23 }
 0x40d   : > { %2176 = vst [vmem:[%s4050_s30 + $0x188] sm:$0xff] %v2112_v27  ;;  %v2050_v28 = vmul.f32 %v1986_v3, %v1701_v26 }
 0x40e   : > { %v2113_v41 = vmul.f32 0.125, %v2049_v14 }
 0x40f   : > { %v1705_v35 = vpop.f32.mrb[84].mxu0  ;;  %v2114_v33 = vmul.f32 0.125, %v2050_v28 }
 0x410   : > { %v1707_v32 = vpop.f32.mrb[85].mxu0  ;;  %2177 = vst [vmem:[%s4050_s30 + $0x190] sm:$0xff] %v2113_v41  ;;  %v2051_v55 = vmul.f32 %v1987_v31, %v1705_v35 }
 0x411   : > { %2178 = vst [vmem:[%s4050_s30 + $0x198] sm:$0xff] %v2114_v33  ;;  %v2052_v34 = vmul.f32 %v1988_v49, %v1707_v32 }
 0x412   : > { %v2115_v7 = vmul.f32 0.125, %v2051_v55 }
 0x413   : > { %v1711_v4 = vpop.f32.mrb[86].mxu0  ;;  %v2116_v42 = vmul.f32 0.125, %v2052_v34 }
 0x414   : > { %v1713_v40 = vpop.f32.mrb[87].mxu0  ;;  %2179 = vst [vmem:[%s4050_s30 + $0x1a0] sm:$0xff] %v2115_v7  ;;  %v2053_v25 = vmul.f32 %v1989_v39, %v1711_v4 }
 0x415   : > { %2180 = vst [vmem:[%s4050_s30 + $0x1a8] sm:$0xff] %v2116_v42  ;;  %v2054_v43 = vmul.f32 %v1990_v17, %v1713_v40 }
 0x416   : > { %v2117_v45 = vmul.f32 0.125, %v2053_v25 }
 0x417   : > { %v1717_v37 = vpop.f32.mrb[88].mxu0  ;;  %v2118_v53 = vmul.f32 0.125, %v2054_v43 }
 0x418   : > { %v1719_v47 = vpop.f32.mrb[89].mxu0  ;;  %2181 = vst [vmem:[%s4050_s30 + $0x1b0] sm:$0xff] %v2117_v45  ;;  %v2055_v54 = vmul.f32 %v1991_v46, %v1717_v37 }
 0x419   : > { %2182 = vst [vmem:[%s4050_s30 + $0x1b8] sm:$0xff] %v2118_v53  ;;  %v2056_v6 = vmul.f32 %v1992_v52, %v1719_v47 }
 0x41a   : > { %v2119_v15 = vmul.f32 0.125, %v2055_v54 }
 0x41b   : > { %v1723_v56 = vpop.f32.mrb[90].mxu0  ;;  %v2120_v60 = vmul.f32 0.125, %v2056_v6 }
 0x41c   : > { %v1725_v59 = vpop.f32.mrb[91].mxu0  ;;  %2183 = vst [vmem:[%s4050_s30 + $0x1c0] sm:$0xff] %v2119_v15  ;;  %v2057_v30 = vmul.f32 %v1993_v2, %v1723_v56 }
 0x41d   : > { %2184 = vst [vmem:[%s4050_s30 + $0x1c8] sm:$0xff] %v2120_v60  ;;  %v2058_v1 = vmul.f32 %v1994_v22, %v1725_v59 }
 0x41e   : > { %v2121_v44 = vmul.f32 0.125, %v2057_v30 }
 0x41f   : > { %v1729_v36 = vpop.f32.mrb[92].mxu0  ;;  %v2122_v0 = vmul.f32 0.125, %v2058_v1 }
 0x420   : > { %v1731_v63 = vpop.f32.mrb[93].mxu0  ;;  %2185 = vst [vmem:[%s4050_s30 + $0x1d0] sm:$0xff] %v2121_v44  ;;  %v2059_v58 = vmul.f32 %v1995_v62, %v1729_v36 }
 0x421   : > { %2186 = vst [vmem:[%s4050_s30 + $0x1d8] sm:$0xff] %v2122_v0  ;;  %v2060_v8 = vmul.f32 %v1996_v50, %v1731_v63 }
 0x422   : > { %v2123_v10 = vmul.f32 0.125, %v2059_v58 }
 0x423   : > { %v1735_v61 = vpop.f32.mrb[94].mxu0  ;;  %v2124_v13 = vmul.f32 0.125, %v2060_v8 }
 0x424   : > { %v1737_v11 = vpop.f32.mrb[95].mxu0  ;;  %2187 = vst [vmem:[%s4050_s30 + $0x1e0] sm:$0xff] %v2123_v10  ;;  %v2061_v29 = vmul.f32 %v1997_v9, %v1735_v61 }
 0x425   : > { %2188 = vst [vmem:[%s4050_s30 + $0x1e8] sm:$0xff] %v2124_v13  ;;  %v2062_v51 = vmul.f32 %v1998_v18, %v1737_v11 }
 0x426   : > { %v2125_v38 = vmul.f32 0.125, %v2061_v29 }
 0x427   : > { %v2126_v16 = vmul.f32 0.125, %v2062_v51 }
 0x428   : > { %2189 = vst [vmem:[%s4050_s30 + $0x1f0] sm:$0xff] %v2125_v38 }
 0x429   : > { %2190 = vst [vmem:[%s4050_s30 + $0x1f8] sm:$0xff] %v2126_v16 }
 0x42a   : > { %3178 = shalt.err (!%p3175_p1)
}
 0x42b   : > { %s3179_s12 = scalar_lea.hbm %s4119_s10, 8192  ;;  %s3183_s9 = scalar_lea.hbm %s4217_s6, 16384 }
 0x42c   : > { %p3180_p10 = scmp.ne.s32.totalorder %s4119_s10, %s3179_s12  ;;  %p3184_p3 = scmp.lt.u32.totalorder %s4119_s10, %s4217_s6 }
 0x42d   : > { %p3185_p12 = scmp.lt.u32.totalorder %s3183_s9, %s3179_s12  ;;  %p3187_p6 = scmp.lt.u32.totalorder %s3179_s12, %s4119_s10 }
 0x42e   : > { %p3181_p11 = pnand %p3180_p10, %p4218_p0 }
 0x42f   : > { %p3186_p13 = por %p3185_p12, %p3184_p3 }
 0x430   : > { %p3182_p8 = pneg %p3181_p11 }
 0x431   : > { %p3188_p7 = por %p3187_p6, %p3186_p13 }
 0x433   : > { %p3189_p5 = pnand %p3188_p7, %p3182_p8 }
 0x435   : > { %3192 = shalt.err (!%p3189_p5)
}
 0x436   : > { %s3275_s17 = smov 256   ;;  %s3276_s30 = smov 16  }
 0x437   : > { %2642 = dma.vmem_to_hbm [thread:$0]  (%p4218_p0), %s4121_s15, 8192, %s4119_s10, %s2192_s27, %s3275_s17, %s3275_s17, %s3276_s30  }
 0x438 PF: > { %s2220_s19 = sand.u32 1, %s3243_s24   ;;  %p4219_p2 = scmp.ne.s32.totalorder %s4207_s23, 0 }
 0x439   : > { %p4220_p4 = scmp.ge.s32.totalorder %s3263_s29, 2  ;;  %s2221_s11 = scalar_lea.sflag [#allocation4], %s2220_s19 }
 0x43b   : > { %p2668_p9 = pnand %p4220_p4, %p4219_p2 }
 0x43d   : > { %3238 = dma.done.wait (!%p2668_p9), %s2221_s11, 8192  }
 0x43e   : > { %3240 = vsyncadd (!%p2668_p9), %s2221_s11, 4294959104  ;;  %s28_s29 = sadd.s32 1, %s3263_s29   ;;  %s4221_s24 = smov %s3247_s25 }
 0x43f   : > { %p25_p1 = scmp.ge.s32.totalorder %s28_s29, 4   ;;  %s4222_s25 = smov %s3251_s26 }
 0x440   : > { %s4223_s26 = smov %s3517_s22  ;;  %s4224_s27 = smov %s3259_s28 }
 0x441   : > { %s4225_s28 = smov %s4227_s21  ;;  %27 = sbr.rel (!%p25_p1) target bundleno = 17 (0x11), region = 134 }
 0x448   :  { %2226 = vsyncpa [#allocation3], 1 }
 0x449   :  { %2228 = vsyncpa [#allocation3 + $0x1], 1 }
 0x44a   :  { %2229 = vsyncpa [#allocation6], 1 }
 0x44b   :  { %2231 = vsyncpa [#allocation6 + $0x1], 1 }
 0x44c   :  { %2232 = vsyncpa [#allocation9], 1 }
 0x44d   :  { %2233 = vsyncpa [#allocation12], 1 }
 0x44e   :  { %2234 = vsyncpa [#allocation4], 1 }
 0x44f   :  { %2236 = vsyncpa [#allocation4 + $0x1], 1 }

</bundles_post_ra>
